<compile_context>
chip_gen: v7x
topology: tpu7x:2x2x1
jax: 0.10.0
libtpu: 0.0.40
codegen_flags: <defaults>
</compile_context>

<pallas_src>
import functools

import jax
import jax.numpy as jnp
from jax.experimental import pallas as pl
from jax.experimental.pallas import tpu as pltpu

_VMEM_LIMIT_BYTES = 48 * 1024 * 1024   # explicit budget; fits v5e/v6e/v7x
_MAX_TILE_M = 512                      # matmul pixel-tile (lane axis)
_MAX_TILE_R = 256                      # LayerNorm row-tile


def _pick_tile(dim, unit, max_tile):
    """Largest tile <= max_tile that is a multiple of `unit` and divides `dim`.
    Falls back to the full dim (always a legal TPU block shape)."""
    if dim <= max_tile:
        return dim
    t = (max_tile // unit) * unit
    while t >= unit:
        if dim % t == 0:
            return t
        t -= unit
    return dim


# --------------------------------------------------------------------------
# Pallas kernels
# --------------------------------------------------------------------------
def _matmul_kernel(*refs, n_a, relu):
    """o(N, tm) = w(N, K) @ (sum of n_a A tiles)(K, tm) + bias(N, 1)."""
    w_ref = refs[0]
    a_refs = refs[1:1 + n_a]
    b_ref = refs[1 + n_a]
    o_ref = refs[2 + n_a]
    a = a_refs[0][...]
    for r in a_refs[1:]:              # fused elementwise sum of the A operands
        a = a + r[...]
    acc = jnp.dot(w_ref[...], a.astype(jnp.bfloat16),
                  preferred_element_type=jnp.float32)
    acc = acc + b_ref[...]
    if relu:
        acc = jnp.maximum(acc, 0.0)
    o_ref[...] = acc


def matmul_lane_dense(w2d, a_list, bias, relu=False):
    """out(N, M) = w2d(N, K) @ sum(a_list)(K, M) + bias(N,).

    Lane-dense output (pixel dim M last), gridded + double-buffer pipelined
    over M, bf16 operands, f32 MXU accumulation, bias/ReLU fused.
    """
    N, K = w2d.shape
    M = a_list[0].shape[1]
    tm = _pick_tile(M, 128, _MAX_TILE_M)

    in_specs = [pl.BlockSpec((N, K), lambda m: (0, 0))]
    for _ in a_list:
        in_specs.append(pl.BlockSpec((K, tm), lambda m: (0, m)))
    in_specs.append(pl.BlockSpec((N, 1), lambda m: (0, 0)))

    return pl.pallas_call(
        functools.partial(_matmul_kernel, n_a=len(a_list), relu=relu),
        out_shape=jax.ShapeDtypeStruct((N, M), jnp.float32),
        grid=(M // tm,),
        in_specs=in_specs,
        out_specs=pl.BlockSpec((N, tm), lambda m: (0, m)),
        compiler_params=pltpu.CompilerParams(
            dimension_semantics=("parallel",),
            vmem_limit_bytes=_VMEM_LIMIT_BYTES),
    )(w2d.astype(jnp.bfloat16), *a_list, bias.reshape(N, 1).astype(jnp.float32))


def _add_ln_mish_kernel(*refs, has_res):
    """o = Mish(LayerNorm(x + y)) (+ res); rows = (channel, batch), cols = F*T."""
    if has_res:
        x_ref, y_ref, g_ref, b_ref, r_ref, o_ref = refs
    else:
        x_ref, y_ref, g_ref, b_ref, o_ref = refs
    v = x_ref[...] + y_ref[...]
    mean = jnp.mean(v, axis=-1, keepdims=True)
    var = jnp.mean((v - mean) ** 2, axis=-1, keepdims=True)
    vn = (v - mean) * jax.lax.rsqrt(var + 1e-5)
    y = vn * g_ref[...] + b_ref[...]
    # Mish(y) = y*tanh(softplus(y)) == y*((1+e^y)^2 - 1)/((1+e^y)^2 + 1):
    # one EUP transcendental instead of exp+log+tanh.
    t = jnp.exp(jnp.minimum(y, 20.0))            # clamp: result == y beyond 20
    u2 = (1.0 + t) * (1.0 + t)
    m = y * (u2 - 1.0) * pl.reciprocal(u2 + 1.0, approx=True)
    if has_res:
        m = m + r_ref[...]
    o_ref[...] = m


def add_ln_mish(a, b, gamma, beta, batch, res=None):
    """a, b: (C, B*F*T) f32.  LayerNorm over (F, T) per (c, b) row (eps=1e-5),
    Mish, then an optional fused residual add.  Returns (C, B*F*T)."""
    C, M = a.shape
    D = gamma.shape[0] * gamma.shape[1]
    R = C * batch
    tr = _pick_tile(R, 8, _MAX_TILE_R)

    row_spec = pl.BlockSpec((tr, D), lambda r: (r, 0))
    par_spec = pl.BlockSpec((1, D), lambda r: (0, 0))
    args = [a.reshape(R, D), b.reshape(R, D),
            gamma.reshape(1, D).astype(jnp.float32),
            beta.reshape(1, D).astype(jnp.float32)]
    in_specs = [row_spec, row_spec, par_spec, par_spec]
    if res is not None:
        args.append(res.reshape(R, D))
        in_specs.append(row_spec)

    out = pl.pallas_call(
        functools.partial(_add_ln_mish_kernel, has_res=res is not None),
        out_shape=jax.ShapeDtypeStruct((R, D), jnp.float32),
        grid=(R // tr,),
        in_specs=in_specs,
        out_specs=row_spec,
        compiler_params=pltpu.CompilerParams(
            dimension_semantics=("parallel",),
            vmem_limit_bytes=_VMEM_LIMIT_BYTES),
    )(*args)
    return out.reshape(C, M)


# --------------------------------------------------------------------------
# Convolution helpers (channel-major layout)
# --------------------------------------------------------------------------
def im2col(x, ksize, stride, padding):
    """x: (C, B, H, W) f32 -> A: (C*k*k, B*Ho*Wo) bf16.  Lane-friendly layout,
    no 5-D transpose; K-order (cin, tap) matches w.reshape(Cout, Cin*k*k)."""
    # TODO(synk): groups > 1 not supported (example uses groups=1).
    C, B, H, W = x.shape
    Ho = (H + 2 * padding - ksize) // stride + 1
    Wo = (W + 2 * padding - ksize) // stride + 1
    xp = jnp.pad(x, ((0, 0), (0, 0), (padding, padding), (padding, padding)))
    xp = xp.astype(jnp.bfloat16)
    taps = []
    for i in range(ksize):
        for j in range(ksize):
            taps.append(xp[:, :, i:i + stride * Ho:stride,
                           j:j + stride * Wo:stride].reshape(C, 1, B * Ho * Wo))
    A = jnp.concatenate(taps, axis=1).reshape(C * ksize * ksize, B * Ho * Wo)
    return A, Ho, Wo


# --------------------------------------------------------------------------
# FourierUnit / SpectralTransform (standard FFC; BN at init is identity -> omitted)
# --------------------------------------------------------------------------
def fourier_unit(x, conv_w):
    """x: (C, B, H, W) f32; conv_w: (2C, 2C, 1, 1).  Returns (C, B, H, W) f32."""
    C, B, H, W = x.shape
    ff = jnp.fft.rfftn(x, axes=(-2, -1), norm="ortho")            # (C, B, H, Wf)
    Wf = ff.shape[-1]
    stacked = jnp.stack((ff.real, ff.imag), axis=1).reshape(2 * C, B * H * Wf)
    y = matmul_lane_dense(conv_w.reshape(2 * C, 2 * C),
                          [stacked.astype(jnp.bfloat16)],
                          jnp.zeros((2 * C,), jnp.float32), relu=True)
    y = y.reshape(C, 2, B, H, Wf)
    comp = jax.lax.complex(y[:, 0], y[:, 1])
    return jnp.fft.irfftn(comp, s=(H, W), axes=(-2, -1), norm="ortho")


def spectral_transform(x_g, st, enable_lfu):
    """x_g: (in_cg, B, H, W) -> (out_cg, B*H*W)."""
    # TODO(synk): stride=2 AvgPool downsample branch not implemented (stride=1).
    in_cg, B, H, W = x_g.shape
    cg2 = st["conv1_w"].shape[0]
    out_cg = st["conv2_w"].shape[0]
    M = B * H * W

    # conv1: 1x1 (+ReLU) -- direct matmul fast path, no im2col.
    x = matmul_lane_dense(st["conv1_w"].reshape(cg2, in_cg),
                          [x_g.reshape(in_cg, M).astype(jnp.bfloat16)],
                          st["conv1_b"], relu=True)                   # (cg2, M)
    x4 = x.reshape(cg2, B, H, W)

    fu_out = fourier_unit(x4, st["fu_w"])                             # (cg2,B,H,W)

    terms = [x, fu_out.reshape(cg2, M)]
    if enable_lfu:
        n = 2
        xs = x4[: cg2 // 4]
        xs = jnp.concatenate(jnp.split(xs, n, axis=-2), axis=0)
        xs = jnp.concatenate(jnp.split(xs, n, axis=-1), axis=0)       # (cg2,B,H/2,W/2)
        xs = fourier_unit(xs, st["lfu_w"])
        xs = jnp.tile(xs, (1, 1, n, n))                               # (cg2,B,H,W)
        terms.append(xs.reshape(cg2, M))

    # conv2: 1x1; the (x + fu + lfu) 3-way sum is fused into the matmul kernel.
    return matmul_lane_dense(st["conv2_w"].reshape(out_cg, cg2), terms,
                             st["conv2_b"])


# --------------------------------------------------------------------------
# FFCBlock and BasicBlock forward (channel-major internal layout)
# --------------------------------------------------------------------------
def ffc_block(x_l, x_g, p, *, padding, stride, enable_lfu,
              res_l=None, res_g=None):
    """x_l: (in_cl, B, F, T), x_g: (in_cg, B, F, T).  Optional residuals (same
    layout, channel counts already matching the block outputs) are fused into
    the final LayerNorm+Mish kernels as a post-activation add."""
    _, B, _, _ = x_l.shape
    out_cl = p["l2l_w"].shape[0]
    out_cg = p["l2g_w"].shape[0]
    ksize = p["l2l_w"].shape[2]

    # l2l and l2g share x_l's im2col patches -> one fused matmul.
    A_l, Ho, Wo = im2col(x_l, ksize, stride, padding)
    w_cat = jnp.concatenate(
        [p["l2l_w"].reshape(out_cl, -1), p["l2g_w"].reshape(out_cg, -1)], axis=0)
    b_cat = jnp.concatenate([p["l2l_b"], p["l2g_b"]], axis=0)
    y_cat = matmul_lane_dense(w_cat, [A_l], b_cat)        # (out_cl+out_cg, M)
    l2l_out, l2g_out = y_cat[:out_cl], y_cat[out_cl:]

    # g2l 3x3 conv.
    A_g, _, _ = im2col(x_g, ksize, stride, padding)
    g2l_out = matmul_lane_dense(p["g2l_w"].reshape(out_cl, -1), [A_g], p["g2l_b"])

    # g2g spectral transform.
    g2g_out = spectral_transform(x_g, p["st"], enable_lfu)  # (out_cg, M)

    # Fused add + LayerNorm(F,T) + Mish (+ optional residual).
    out_l = add_ln_mish(l2l_out, g2l_out, p["norm_l_g"], p["norm_l_b"], B, res=res_l)
    out_g = add_ln_mish(l2g_out, g2g_out, p["norm_g_g"], p["norm_g_b"], B, res=res_g)
    return out_l.reshape(out_cl, B, Ho, Wo), out_g.reshape(out_cg, B, Ho, Wo)


def _channel_pad(x, target_c):
    """Symmetric zero-pad along the channel axis (matches the reference pad)."""
    c = x.shape[0]
    if c == target_c:
        return x
    c1 = (target_c - c) // 2
    c2 = target_c - c - c1
    return jnp.pad(x, ((c1, c2), (0, 0), (0, 0), (0, 0)))


def basic_block(x, params, in_ch, out_ch, ratio_gin, ratio_gout, padding,
                enable_lfu, stride=1):
    # TODO(synk): degenerate splits (ratio_gin/gout in {0,1}) are not handled.
    in_cg = int(in_ch * ratio_gin)
    in_cl = in_ch - in_cg

    xc = jnp.transpose(x, (1, 0, 2, 3))                  # (C, B, F, T)
    x_l, x_g = xc[:in_cl], xc[in_cl:]

    z_l, z_g = ffc_block(x_l, x_g, params["block1"], padding=padding,
                         stride=stride, enable_lfu=enable_lfu)

    # Residual from the ORIGINAL input split, channel-padded like the
    # reference; fused into block2's final LN+Mish kernels.
    out_cl2 = params["block2"]["l2l_w"].shape[0]
    out_cg2 = params["block2"]["l2g_w"].shape[0]
    res_l = _channel_pad(x_l, out_cl2)
    res_g = _channel_pad(x_g, out_cg2)

    z_l, z_g = ffc_block(z_l, z_g, params["block2"], padding=padding,
                         stride=stride, enable_lfu=enable_lfu,
                         res_l=res_l, res_g=res_g)

    z = jnp.concatenate((z_l, z_g), axis=0)              # (out_ch, B, F, T)
    return jnp.transpose(z, (1, 0, 2, 3))                # (B, out_ch, F, T)


# --------------------------------------------------------------------------
# Deterministic parameter init
# --------------------------------------------------------------------------
def _init_conv(key, cout, cin, k, with_bias=True):
    kw, kb = jax.random.split(key)
    fan_in = cin * k * k
    w = jax.random.normal(kw, (cout, cin, k, k), jnp.float32) / jnp.sqrt(float(fan_in))
    b = (jax.random.normal(kb, (cout,), jnp.float32) * 0.01) if with_bias \
        else jnp.zeros((cout,), jnp.float32)
    return w, b


def init_ffc_block(key, in_ch, out_ch, ratio_gin, ratio_gout, ksize, F, T):
    in_cg = int(in_ch * ratio_gin)
    in_cl = in_ch - in_cg
    out_cg = int(out_ch * ratio_gout)
    out_cl = out_ch - out_cg
    cg2 = out_cg // 2
    ks = jax.random.split(key, 7)
    p = {}
    p["l2l_w"], p["l2l_b"] = _init_conv(ks[0], out_cl, in_cl, ksize)
    p["g2l_w"], p["g2l_b"] = _init_conv(ks[1], out_cl, in_cg, ksize)
    p["l2g_w"], p["l2g_b"] = _init_conv(ks[2], out_cg, in_cl, ksize)
    st = {}
    st["conv1_w"], st["conv1_b"] = _init_conv(ks[3], cg2, in_cg, 1, with_bias=False)
    st["fu_w"], _ = _init_conv(ks[4], 2 * cg2, 2 * cg2, 1, with_bias=False)
    st["lfu_w"], _ = _init_conv(ks[5], 2 * cg2, 2 * cg2, 1, with_bias=False)
    st["conv2_w"], st["conv2_b"] = _init_conv(ks[6], out_cg, cg2, 1, with_bias=False)
    p["st"] = st
    p["norm_l_g"] = jnp.ones((F, T), jnp.float32)
    p["norm_l_b"] = jnp.zeros((F, T), jnp.float32)
    p["norm_g_g"] = jnp.ones((F, T), jnp.float32)
    p["norm_g_b"] = jnp.zeros((F, T), jnp.float32)
    return p


# --------------------------------------------------------------------------
if __name__ == "__main__":
    B, C_in, F, T = 2, 16, 8, 8
    C_out = 32
    ratio_gin = ratio_gout = 0.5
    ksize, stride, padding = 3, 1, 1
    enable_lfu = True

    key = jax.random.PRNGKey(0)
    kx, k1, k2 = jax.random.split(key, 3)
    x = jax.random.normal(kx, (B, C_in, F, T), jnp.float32)
    params = {
        "block1": init_ffc_block(k1, C_in, C_in, ratio_gin, ratio_gout, ksize, F, T),
        "block2": init_ffc_block(k2, C_in, C_out, ratio_gin, ratio_gout, ksize, F, T),
    }

    @jax.jit
    def fwd(x, params):
        return basic_block(x, params, C_in, C_out, ratio_gin, ratio_gout,
                           padding, enable_lfu, stride=stride)

    z = fwd(x, params)
    jax.block_until_ready(z)
    assert z.shape == (B, C_out, F, T), z.shape
    assert bool(jnp.all(jnp.isfinite(z)))
    print("KERNEL_OK")
</pallas_src>

<mosaic_0001>
module attributes {stable_mosaic.version = 11 : i64} {
  func.func @_matmul_kernel(%arg0: i32, %arg1: memref<4x8xbf16, #tpu.memory_space<vmem>>, %arg2: memref<8x128xbf16, #tpu.memory_space<vmem>>, %arg3: memref<4x1xf32, #tpu.memory_space<vmem>>, %arg4: memref<4x128xf32, #tpu.memory_space<vmem>>) attributes {dimension_semantics = [#tpu.dimension_semantics<parallel>], iteration_bounds = array<i64: 1>, scalar_prefetch = 0 : i64, scratch_operands = 0 : i64, tpu.core_type = #tpu.core_type<tc>, window_params = [{pipeline_mode = #tpu.pipeline_mode<synchronous>, transform_indices = @transform_0, window_bounds = array<i64: 4, 8>}, {transform_indices = @transform_1, window_bounds = array<i64: 8, 128>}, {pipeline_mode = #tpu.pipeline_mode<synchronous>, transform_indices = @transform_2, window_bounds = array<i64: 4, 1>}, {transform_indices = @transform_3, window_bounds = array<i64: 4, 128>}]} {
    %c0 = arith.constant 0 : index
    %c0_0 = arith.constant 0 : index
    %0 = vector.load %arg2[%c0, %c0_0] : memref<8x128xbf16, #tpu.memory_space<vmem>>, vector<8x128xbf16>
    %c0_1 = arith.constant 0 : index
    %c0_2 = arith.constant 0 : index
    %1 = vector.load %arg1[%c0_1, %c0_2] : memref<4x8xbf16, #tpu.memory_space<vmem>>, vector<4x8xbf16>
    %cst = arith.constant dense<0.000000e+00> : vector<4x128xf32>
    %2 = tpu.matmul %1, %0, %cst {dimension_numbers = #tpu.dot_dimension_numbers<[1], [0], [0], [1], [0, 0, 1, 1], [], []>} : vector<4x8xbf16>, vector<8x128xbf16>, vector<4x128xf32> -> vector<4x128xf32>
    %c0_3 = arith.constant 0 : index
    %c0_4 = arith.constant 0 : index
    %3 = vector.load %arg3[%c0_3, %c0_4] : memref<4x1xf32, #tpu.memory_space<vmem>>, vector<4x1xf32>
    %4 = vector.broadcast %3 : vector<4x1xf32> to vector<4x128xf32>
    %5 = arith.addf %2, %4 : vector<4x128xf32>
    %cst_5 = arith.constant 0.000000e+00 : f32
    %6 = vector.broadcast %cst_5 : f32 to vector<4x128xf32>
    %7 = arith.maximumf %5, %6 : vector<4x128xf32>
    %c0_6 = arith.constant 0 : index
    %c0_7 = arith.constant 0 : index
    %8 = vector.load %arg4[%c0_6, %c0_7] : memref<4x128xf32, #tpu.memory_space<vmem>>, vector<4x128xf32>
    tpu.vector_store %arg4[%c0_6, %c0_7], %7 {strides = array<i32>} : memref<4x128xf32, #tpu.memory_space<vmem>>, vector<4x128xf32>,
    return
  }
  func.func @transform_0(%arg0: i32) -> (i32, i32) {
    %c0_i32 = arith.constant 0 : i32
    %c0_i32_0 = arith.constant 0 : i32
    %c0_i32_1 = arith.constant 0 : i32
    return %c0_i32, %c0_i32_0 : i32, i32
  }
  func.func @transform_1(%arg0: i32) -> (i32, i32) {
    %c0_i32 = arith.constant 0 : i32
    %c0_i32_0 = arith.constant 0 : i32
    return %c0_i32, %arg0 : i32, i32
  }
  func.func @transform_2(%arg0: i32) -> (i32, i32) {
    %c0_i32 = arith.constant 0 : i32
    %c0_i32_0 = arith.constant 0 : i32
    %c0_i32_1 = arith.constant 0 : i32
    return %c0_i32, %c0_i32_0 : i32, i32
  }
  func.func @transform_3(%arg0: i32) -> (i32, i32) {
    %c0_i32 = arith.constant 0 : i32
    %c0_i32_0 = arith.constant 0 : i32
    return %c0_i32, %arg0 : i32, i32
  }
}

module attributes {stable_mosaic.version = 11 : i64} {
  func.func @_matmul_kernel(%arg0: i32, %arg1: memref<8x8xbf16, #tpu.memory_space<vmem>>, %arg2: memref<8x24xbf16, #tpu.memory_space<vmem>>, %arg3: memref<8x1xf32, #tpu.memory_space<vmem>>, %arg4: memref<8x24xf32, #tpu.memory_space<vmem>>) attributes {dimension_semantics = [#tpu.dimension_semantics<parallel>], iteration_bounds = array<i64: 1>, scalar_prefetch = 0 : i64, scratch_operands = 0 : i64, tpu.core_type = #tpu.core_type<tc>, window_params = [{pipeline_mode = #tpu.pipeline_mode<synchronous>, transform_indices = @transform_0, window_bounds = array<i64: 8, 8>}, {transform_indices = @transform_1, window_bounds = array<i64: 8, 24>}, {pipeline_mode = #tpu.pipeline_mode<synchronous>, transform_indices = @transform_2, window_bounds = array<i64: 8, 1>}, {transform_indices = @transform_3, window_bounds = array<i64: 8, 24>}]} {
    %c0 = arith.constant 0 : index
    %c0_0 = arith.constant 0 : index
    %0 = vector.load %arg2[%c0, %c0_0] : memref<8x24xbf16, #tpu.memory_space<vmem>>, vector<8x24xbf16>
    %c0_1 = arith.constant 0 : index
    %c0_2 = arith.constant 0 : index
    %1 = vector.load %arg1[%c0_1, %c0_2] : memref<8x8xbf16, #tpu.memory_space<vmem>>, vector<8x8xbf16>
    %cst = arith.constant dense<0.000000e+00> : vector<8x24xf32>
    %2 = tpu.matmul %1, %0, %cst {dimension_numbers = #tpu.dot_dimension_numbers<[1], [0], [0], [1], [0, 0, 1, 1], [], []>} : vector<8x8xbf16>, vector<8x24xbf16>, vector<8x24xf32> -> vector<8x24xf32>
    %c0_3 = arith.constant 0 : index
    %c0_4 = arith.constant 0 : index
    %3 = vector.load %arg3[%c0_3, %c0_4] : memref<8x1xf32, #tpu.memory_space<vmem>>, vector<8x1xf32>
    %4 = vector.broadcast %3 : vector<8x1xf32> to vector<8x24xf32>
    %5 = arith.addf %2, %4 : vector<8x24xf32>
    %cst_5 = arith.constant 0.000000e+00 : f32
    %6 = vector.broadcast %cst_5 : f32 to vector<8x24xf32>
    %7 = arith.maximumf %5, %6 : vector<8x24xf32>
    %c0_6 = arith.constant 0 : index
    %c0_7 = arith.constant 0 : index
    %8 = vector.load %arg4[%c0_6, %c0_7] : memref<8x24xf32, #tpu.memory_space<vmem>>, vector<8x24xf32>
    tpu.vector_store %arg4[%c0_6, %c0_7], %7 {strides = array<i32>} : memref<8x24xf32, #tpu.memory_space<vmem>>, vector<8x24xf32>,
    return
  }
  func.func @transform_0(%arg0: i32) -> (i32, i32) {
    %c0_i32 = arith.constant 0 : i32
    %c0_i32_0 = arith.constant 0 : i32
    %c0_i32_1 = arith.constant 0 : i32
    return %c0_i32, %c0_i32_0 : i32, i32
  }
  func.func @transform_1(%arg0: i32) -> (i32, i32) {
    %c0_i32 = arith.constant 0 : i32
    %c0_i32_0 = arith.constant 0 : i32
    return %c0_i32, %arg0 : i32, i32
  }
  func.func @transform_2(%arg0: i32) -> (i32, i32) {
    %c0_i32 = arith.constant 0 : i32
    %c0_i32_0 = arith.constant 0 : i32
    %c0_i32_1 = arith.constant 0 : i32
    return %c0_i32, %c0_i32_0 : i32, i32
  }
  func.func @transform_3(%arg0: i32) -> (i32, i32) {
    %c0_i32 = arith.constant 0 : i32
    %c0_i32_0 = arith.constant 0 : i32
    return %c0_i32, %arg0 : i32, i32
  }
}

module attributes {stable_mosaic.version = 11 : i64} {
  func.func @_matmul_kernel(%arg0: i32, %arg1: memref<8x8xbf16, #tpu.memory_space<vmem>>, %arg2: memref<8x80xbf16, #tpu.memory_space<vmem>>, %arg3: memref<8x1xf32, #tpu.memory_space<vmem>>, %arg4: memref<8x80xf32, #tpu.memory_space<vmem>>) attributes {dimension_semantics = [#tpu.dimension_semantics<parallel>], iteration_bounds = array<i64: 1>, scalar_prefetch = 0 : i64, scratch_operands = 0 : i64, tpu.core_type = #tpu.core_type<tc>, window_params = [{pipeline_mode = #tpu.pipeline_mode<synchronous>, transform_indices = @transform_0, window_bounds = array<i64: 8, 8>}, {transform_indices = @transform_1, window_bounds = array<i64: 8, 80>}, {pipeline_mode = #tpu.pipeline_mode<synchronous>, transform_indices = @transform_2, window_bounds = array<i64: 8, 1>}, {transform_indices = @transform_3, window_bounds = array<i64: 8, 80>}]} {
    %c0 = arith.constant 0 : index
    %c0_0 = arith.constant 0 : index
    %0 = vector.load %arg2[%c0, %c0_0] : memref<8x80xbf16, #tpu.memory_space<vmem>>, vector<8x80xbf16>
    %c0_1 = arith.constant 0 : index
    %c0_2 = arith.constant 0 : index
    %1 = vector.load %arg1[%c0_1, %c0_2] : memref<8x8xbf16, #tpu.memory_space<vmem>>, vector<8x8xbf16>
    %cst = arith.constant dense<0.000000e+00> : vector<8x80xf32>
    %2 = tpu.matmul %1, %0, %cst {dimension_numbers = #tpu.dot_dimension_numbers<[1], [0], [0], [1], [0, 0, 1, 1], [], []>} : vector<8x8xbf16>, vector<8x80xbf16>, vector<8x80xf32> -> vector<8x80xf32>
    %c0_3 = arith.constant 0 : index
    %c0_4 = arith.constant 0 : index
    %3 = vector.load %arg3[%c0_3, %c0_4] : memref<8x1xf32, #tpu.memory_space<vmem>>, vector<8x1xf32>
    %4 = vector.broadcast %3 : vector<8x1xf32> to vector<8x80xf32>
    %5 = arith.addf %2, %4 : vector<8x80xf32>
    %cst_5 = arith.constant 0.000000e+00 : f32
    %6 = vector.broadcast %cst_5 : f32 to vector<8x80xf32>
    %7 = arith.maximumf %5, %6 : vector<8x80xf32>
    %c0_6 = arith.constant 0 : index
    %c0_7 = arith.constant 0 : index
    %8 = vector.load %arg4[%c0_6, %c0_7] : memref<8x80xf32, #tpu.memory_space<vmem>>, vector<8x80xf32>
    tpu.vector_store %arg4[%c0_6, %c0_7], %7 {strides = array<i32>} : memref<8x80xf32, #tpu.memory_space<vmem>>, vector<8x80xf32>,
    return
  }
  func.func @transform_0(%arg0: i32) -> (i32, i32) {
    %c0_i32 = arith.constant 0 : i32
    %c0_i32_0 = arith.constant 0 : i32
    %c0_i32_1 = arith.constant 0 : i32
    return %c0_i32, %c0_i32_0 : i32, i32
  }
  func.func @transform_1(%arg0: i32) -> (i32, i32) {
    %c0_i32 = arith.constant 0 : i32
    %c0_i32_0 = arith.constant 0 : i32
    return %c0_i32, %arg0 : i32, i32
  }
  func.func @transform_2(%arg0: i32) -> (i32, i32) {
    %c0_i32 = arith.constant 0 : i32
    %c0_i32_0 = arith.constant 0 : i32
    %c0_i32_1 = arith.constant 0 : i32
    return %c0_i32, %c0_i32_0 : i32, i32
  }
  func.func @transform_3(%arg0: i32) -> (i32, i32) {
    %c0_i32 = arith.constant 0 : i32
    %c0_i32_0 = arith.constant 0 : i32
    return %c0_i32, %arg0 : i32, i32
  }
}

module attributes {stable_mosaic.version = 11 : i64} {
  func.func @_matmul_kernel(%arg0: i32, %arg1: memref<8x4xbf16, #tpu.memory_space<vmem>>, %arg2: memref<4x128xf32, #tpu.memory_space<vmem>>, %arg3: memref<4x128xf32, #tpu.memory_space<vmem>>, %arg4: memref<4x128xf32, #tpu.memory_space<vmem>>, %arg5: memref<8x1xf32, #tpu.memory_space<vmem>>, %arg6: memref<8x128xf32, #tpu.memory_space<vmem>>) attributes {dimension_semantics = [#tpu.dimension_semantics<parallel>], iteration_bounds = array<i64: 1>, scalar_prefetch = 0 : i64, scratch_operands = 0 : i64, tpu.core_type = #tpu.core_type<tc>, window_params = [{pipeline_mode = #tpu.pipeline_mode<synchronous>, transform_indices = @transform_0, window_bounds = array<i64: 8, 4>}, {transform_indices = @transform_1, window_bounds = array<i64: 4, 128>}, {transform_indices = @transform_2, window_bounds = array<i64: 4, 128>}, {transform_indices = @transform_3, window_bounds = array<i64: 4, 128>}, {pipeline_mode = #tpu.pipeline_mode<synchronous>, transform_indices = @transform_4, window_bounds = array<i64: 8, 1>}, {transform_indices = @transform_5, window_bounds = array<i64: 8, 128>}]} {
    %c0 = arith.constant 0 : index
    %c0_0 = arith.constant 0 : index
    %0 = vector.load %arg2[%c0, %c0_0] : memref<4x128xf32, #tpu.memory_space<vmem>>, vector<4x128xf32>
    %c0_1 = arith.constant 0 : index
    %c0_2 = arith.constant 0 : index
    %1 = vector.load %arg3[%c0_1, %c0_2] : memref<4x128xf32, #tpu.memory_space<vmem>>, vector<4x128xf32>
    %2 = arith.addf %0, %1 : vector<4x128xf32>
    %c0_3 = arith.constant 0 : index
    %c0_4 = arith.constant 0 : index
    %3 = vector.load %arg4[%c0_3, %c0_4] : memref<4x128xf32, #tpu.memory_space<vmem>>, vector<4x128xf32>
    %4 = arith.addf %2, %3 : vector<4x128xf32>
    %c0_5 = arith.constant 0 : index
    %c0_6 = arith.constant 0 : index
    %5 = vector.load %arg1[%c0_5, %c0_6] : memref<8x4xbf16, #tpu.memory_space<vmem>>, vector<8x4xbf16>
    %6 = arith.truncf %4 : vector<4x128xf32> to vector<4x128xbf16>
    %cst = arith.constant dense<0.000000e+00> : vector<8x128xf32>
    %7 = tpu.matmul %5, %6, %cst {dimension_numbers = #tpu.dot_dimension_numbers<[1], [0], [0], [1], [0, 0, 1, 1], [], []>} : vector<8x4xbf16>, vector<4x128xbf16>, vector<8x128xf32> -> vector<8x128xf32>
    %c0_7 = arith.constant 0 : index
    %c0_8 = arith.constant 0 : index
    %8 = vector.load %arg5[%c0_7, %c0_8] : memref<8x1xf32, #tpu.memory_space<vmem>>, vector<8x1xf32>
    %9 = vector.broadcast %8 : vector<8x1xf32> to vector<8x128xf32>
    %10 = arith.addf %7, %9 : vector<8x128xf32>
    %c0_9 = arith.constant 0 : index
    %c0_10 = arith.constant 0 : index
    %11 = vector.load %arg6[%c0_9, %c0_10] : memref<8x128xf32, #tpu.memory_space<vmem>>, vector<8x128xf32>
    tpu.vector_store %arg6[%c0_9, %c0_10], %10 {strides = array<i32>} : memref<8x128xf32, #tpu.memory_space<vmem>>, vector<8x128xf32>,
    return
  }
  func.func @transform_0(%arg0: i32) -> (i32, i32) {
    %c0_i32 = arith.constant 0 : i32
    %c0_i32_0 = arith.constant 0 : i32
    %c0_i32_1 = arith.constant 0 : i32
    return %c0_i32, %c0_i32_0 : i32, i32
  }
  func.func @transform_1(%arg0: i32) -> (i32, i32) {
    %c0_i32 = arith.constant 0 : i32
    %c0_i32_0 = arith.constant 0 : i32
    return %c0_i32, %arg0 : i32, i32
  }
  func.func @transform_2(%arg0: i32) -> (i32, i32) {
    %c0_i32 = arith.constant 0 : i32
    %c0_i32_0 = arith.constant 0 : i32
    return %c0_i32, %arg0 : i32, i32
  }
  func.func @transform_3(%arg0: i32) -> (i32, i32) {
    %c0_i32 = arith.constant 0 : i32
    %c0_i32_0 = arith.constant 0 : i32
    return %c0_i32, %arg0 : i32, i32
  }
  func.func @transform_4(%arg0: i32) -> (i32, i32) {
    %c0_i32 = arith.constant 0 : i32
    %c0_i32_0 = arith.constant 0 : i32
    %c0_i32_1 = arith.constant 0 : i32
    return %c0_i32, %c0_i32_0 : i32, i32
  }
  func.func @transform_5(%arg0: i32) -> (i32, i32) {
    %c0_i32 = arith.constant 0 : i32
    %c0_i32_0 = arith.constant 0 : i32
    return %c0_i32, %arg0 : i32, i32
  }
}

module attributes {stable_mosaic.version = 11 : i64} {
  func.func @_matmul_kernel(%arg0: i32, %arg1: memref<16x72xbf16, #tpu.memory_space<vmem>>, %arg2: memref<72x128xbf16, #tpu.memory_space<vmem>>, %arg3: memref<16x1xf32, #tpu.memory_space<vmem>>, %arg4: memref<16x128xf32, #tpu.memory_space<vmem>>) attributes {dimension_semantics = [#tpu.dimension_semantics<parallel>], iteration_bounds = array<i64: 1>, scalar_prefetch = 0 : i64, scratch_operands = 0 : i64, tpu.core_type = #tpu.core_type<tc>, window_params = [{pipeline_mode = #tpu.pipeline_mode<synchronous>, transform_indices = @transform_0, window_bounds = array<i64: 16, 72>}, {transform_indices = @transform_1, window_bounds = array<i64: 72, 128>}, {pipeline_mode = #tpu.pipeline_mode<synchronous>, transform_indices = @transform_2, window_bounds = array<i64: 16, 1>}, {transform_indices = @transform_3, window_bounds = array<i64: 16, 128>}]} {
    %c0 = arith.constant 0 : index
    %c0_0 = arith.constant 0 : index
    %0 = vector.load %arg2[%c0, %c0_0] : memref<72x128xbf16, #tpu.memory_space<vmem>>, vector<72x128xbf16>
    %c0_1 = arith.constant 0 : index
    %c0_2 = arith.constant 0 : index
    %1 = vector.load %arg1[%c0_1, %c0_2] : memref<16x72xbf16, #tpu.memory_space<vmem>>, vector<16x72xbf16>
    %cst = arith.constant dense<0.000000e+00> : vector<16x128xf32>
    %2 = tpu.matmul %1, %0, %cst {dimension_numbers = #tpu.dot_dimension_numbers<[1], [0], [0], [1], [0, 0, 1, 1], [], []>} : vector<16x72xbf16>, vector<72x128xbf16>, vector<16x128xf32> -> vector<16x128xf32>
    %c0_3 = arith.constant 0 : index
    %c0_4 = arith.constant 0 : index
    %3 = vector.load %arg3[%c0_3, %c0_4] : memref<16x1xf32, #tpu.memory_space<vmem>>, vector<16x1xf32>
    %4 = vector.broadcast %3 : vector<16x1xf32> to vector<16x128xf32>
    %5 = arith.addf %2, %4 : vector<16x128xf32>
    %c0_5 = arith.constant 0 : index
    %c0_6 = arith.constant 0 : index
    %6 = vector.load %arg4[%c0_5, %c0_6] : memref<16x128xf32, #tpu.memory_space<vmem>>, vector<16x128xf32>
    tpu.vector_store %arg4[%c0_5, %c0_6], %5 {strides = array<i32>} : memref<16x128xf32, #tpu.memory_space<vmem>>, vector<16x128xf32>,
    return
  }
  func.func @transform_0(%arg0: i32) -> (i32, i32) {
    %c0_i32 = arith.constant 0 : i32
    %c0_i32_0 = arith.constant 0 : i32
    %c0_i32_1 = arith.constant 0 : i32
    return %c0_i32, %c0_i32_0 : i32, i32
  }
  func.func @transform_1(%arg0: i32) -> (i32, i32) {
    %c0_i32 = arith.constant 0 : i32
    %c0_i32_0 = arith.constant 0 : i32
    return %c0_i32, %arg0 : i32, i32
  }
  func.func @transform_2(%arg0: i32) -> (i32, i32) {
    %c0_i32 = arith.constant 0 : i32
    %c0_i32_0 = arith.constant 0 : i32
    %c0_i32_1 = arith.constant 0 : i32
    return %c0_i32, %c0_i32_0 : i32, i32
  }
  func.func @transform_3(%arg0: i32) -> (i32, i32) {
    %c0_i32 = arith.constant 0 : i32
    %c0_i32_0 = arith.constant 0 : i32
    return %c0_i32, %arg0 : i32, i32
  }
}

module attributes {stable_mosaic.version = 11 : i64} {
  func.func @_add_ln_mish_kernel(%arg0: i32, %arg1: memref<16x64xf32, #tpu.memory_space<vmem>>, %arg2: memref<16x64xf32, #tpu.memory_space<vmem>>, %arg3: memref<1x64xf32, #tpu.memory_space<vmem>>, %arg4: memref<1x64xf32, #tpu.memory_space<vmem>>, %arg5: memref<16x64xf32, #tpu.memory_space<vmem>>) attributes {dimension_semantics = [#tpu.dimension_semantics<parallel>], iteration_bounds = array<i64: 1>, scalar_prefetch = 0 : i64, scratch_operands = 0 : i64, tpu.core_type = #tpu.core_type<tc>, window_params = [{transform_indices = @transform_0, window_bounds = array<i64: 16, 64>}, {transform_indices = @transform_1, window_bounds = array<i64: 16, 64>}, {pipeline_mode = #tpu.pipeline_mode<synchronous>, transform_indices = @transform_2, window_bounds = array<i64: 1, 64>}, {pipeline_mode = #tpu.pipeline_mode<synchronous>, transform_indices = @transform_3, window_bounds = array<i64: 1, 64>}, {transform_indices = @transform_4, window_bounds = array<i64: 16, 64>}]} {
    %c0 = arith.constant 0 : index
    %c0_0 = arith.constant 0 : index
    %0 = vector.load %arg1[%c0, %c0_0] : memref<16x64xf32, #tpu.memory_space<vmem>>, vector<16x64xf32>
    %c0_1 = arith.constant 0 : index
    %c0_2 = arith.constant 0 : index
    %1 = vector.load %arg2[%c0_1, %c0_2] : memref<16x64xf32, #tpu.memory_space<vmem>>, vector<16x64xf32>
    %2 = arith.addf %0, %1 : vector<16x64xf32>
    %cst = arith.constant dense<0.000000e+00> : vector<16xf32>
    %3 = vector.multi_reduction <add>, %2, %cst [1] : vector<16x64xf32> to vector<16xf32>
    %4 = vector.shape_cast %3 : vector<16xf32> to vector<16x1xf32>
    %cst_3 = arith.constant 6.400000e+01 : f32
    %5 = vector.broadcast %cst_3 : f32 to vector<16x1xf32>
    %6 = arith.divf %4, %5 : vector<16x1xf32>
    %7 = vector.broadcast %6 : vector<16x1xf32> to vector<16x64xf32>
    %8 = arith.subf %2, %7 : vector<16x64xf32>
    %9 = arith.mulf %8, %8 : vector<16x64xf32>
    %cst_4 = arith.constant dense<0.000000e+00> : vector<16xf32>
    %10 = vector.multi_reduction <add>, %9, %cst_4 [1] : vector<16x64xf32> to vector<16xf32>
    %11 = vector.shape_cast %10 : vector<16xf32> to vector<16x1xf32>
    %cst_5 = arith.constant 6.400000e+01 : f32
    %12 = vector.broadcast %cst_5 : f32 to vector<16x1xf32>
    %13 = arith.divf %11, %12 : vector<16x1xf32>
    %14 = vector.broadcast %6 : vector<16x1xf32> to vector<16x64xf32>
    %15 = arith.subf %2, %14 : vector<16x64xf32>
    %cst_6 = arith.constant 9.99999974E-6 : f32
    %16 = vector.broadcast %cst_6 : f32 to vector<16x1xf32>
    %17 = arith.addf %13, %16 : vector<16x1xf32>
    %18 = math.rsqrt %17 : vector<16x1xf32>
    %19 = vector.broadcast %18 : vector<16x1xf32> to vector<16x64xf32>
    %20 = arith.mulf %15, %19 : vector<16x64xf32>
    %c0_7 = arith.constant 0 : index
    %c0_8 = arith.constant 0 : index
    %21 = vector.load %arg3[%c0_7, %c0_8] : memref<1x64xf32, #tpu.memory_space<vmem>>, vector<1x64xf32>
    %22 = vector.broadcast %21 : vector<1x64xf32> to vector<16x64xf32>
    %23 = arith.mulf %20, %22 : vector<16x64xf32>
    %c0_9 = arith.constant 0 : index
    %c0_10 = arith.constant 0 : index
    %24 = vector.load %arg4[%c0_9, %c0_10] : memref<1x64xf32, #tpu.memory_space<vmem>>, vector<1x64xf32>
    %25 = vector.broadcast %24 : vector<1x64xf32> to vector<16x64xf32>
    %26 = arith.addf %23, %25 : vector<16x64xf32>
    %cst_11 = arith.constant 2.000000e+01 : f32
    %27 = vector.broadcast %cst_11 : f32 to vector<16x64xf32>
    %28 = arith.minimumf %26, %27 : vector<16x64xf32>
    %29 = math.exp %28 : vector<16x64xf32>
    %cst_12 = arith.constant 1.000000e+00 : f32
    %30 = vector.broadcast %cst_12 : f32 to vector<16x64xf32>
    %31 = arith.addf %30, %29 : vector<16x64xf32>
    %cst_13 = arith.constant 1.000000e+00 : f32
    %32 = vector.broadcast %cst_13 : f32 to vector<16x64xf32>
    %33 = arith.addf %32, %29 : vector<16x64xf32>
    %34 = arith.mulf %31, %33 : vector<16x64xf32>
    %cst_14 = arith.constant 1.000000e+00 : f32
    %35 = vector.broadcast %cst_14 : f32 to vector<16x64xf32>
    %36 = arith.subf %34, %35 : vector<16x64xf32>
    %37 = arith.mulf %26, %36 : vector<16x64xf32>
    %cst_15 = arith.constant 1.000000e+00 : f32
    %38 = vector.broadcast %cst_15 : f32 to vector<16x64xf32>
    %39 = arith.addf %34, %38 : vector<16x64xf32>
    %40 = tpu.reciprocal %39 {approx = true} : vector<16x64xf32> -> vector<16x64xf32>
    %41 = arith.mulf %37, %40 : vector<16x64xf32>
    %c0_16 = arith.constant 0 : index
    %c0_17 = arith.constant 0 : index
    %42 = vector.load %arg5[%c0_16, %c0_17] : memref<16x64xf32, #tpu.memory_space<vmem>>, vector<16x64xf32>
    tpu.vector_store %arg5[%c0_16, %c0_17], %41 {strides = array<i32>} : memref<16x64xf32, #tpu.memory_space<vmem>>, vector<16x64xf32>,
    return
  }
  func.func @transform_0(%arg0: i32) -> (i32, i32) {
    %c0_i32 = arith.constant 0 : i32
    %c0_i32_0 = arith.constant 0 : i32
    return %arg0, %c0_i32 : i32, i32
  }
  func.func @transform_1(%arg0: i32) -> (i32, i32) {
    %c0_i32 = arith.constant 0 : i32
    %c0_i32_0 = arith.constant 0 : i32
    return %arg0, %c0_i32 : i32, i32
  }
  func.func @transform_2(%arg0: i32) -> (i32, i32) {
    %c0_i32 = arith.constant 0 : i32
    %c0_i32_0 = arith.constant 0 : i32
    %c0_i32_1 = arith.constant 0 : i32
    return %c0_i32, %c0_i32_0 : i32, i32
  }
  func.func @transform_3(%arg0: i32) -> (i32, i32) {
    %c0_i32 = arith.constant 0 : i32
    %c0_i32_0 = arith.constant 0 : i32
    %c0_i32_1 = arith.constant 0 : i32
    return %c0_i32, %c0_i32_0 : i32, i32
  }
  func.func @transform_4(%arg0: i32) -> (i32, i32) {
    %c0_i32 = arith.constant 0 : i32
    %c0_i32_0 = arith.constant 0 : i32
    return %arg0, %c0_i32 : i32, i32
  }
}

module attributes {stable_mosaic.version = 11 : i64} {
  func.func @_matmul_kernel(%arg0: i32, %arg1: memref<8x72xbf16, #tpu.memory_space<vmem>>, %arg2: memref<72x128xbf16, #tpu.memory_space<vmem>>, %arg3: memref<8x1xf32, #tpu.memory_space<vmem>>, %arg4: memref<8x128xf32, #tpu.memory_space<vmem>>) attributes {dimension_semantics = [#tpu.dimension_semantics<parallel>], iteration_bounds = array<i64: 1>, scalar_prefetch = 0 : i64, scratch_operands = 0 : i64, tpu.core_type = #tpu.core_type<tc>, window_params = [{pipeline_mode = #tpu.pipeline_mode<synchronous>, transform_indices = @transform_0, window_bounds = array<i64: 8, 72>}, {transform_indices = @transform_1, window_bounds = array<i64: 72, 128>}, {pipeline_mode = #tpu.pipeline_mode<synchronous>, transform_indices = @transform_2, window_bounds = array<i64: 8, 1>}, {transform_indices = @transform_3, window_bounds = array<i64: 8, 128>}]} {
    %c0 = arith.constant 0 : index
    %c0_0 = arith.constant 0 : index
    %0 = vector.load %arg2[%c0, %c0_0] : memref<72x128xbf16, #tpu.memory_space<vmem>>, vector<72x128xbf16>
    %c0_1 = arith.constant 0 : index
    %c0_2 = arith.constant 0 : index
    %1 = vector.load %arg1[%c0_1, %c0_2] : memref<8x72xbf16, #tpu.memory_space<vmem>>, vector<8x72xbf16>
    %cst = arith.constant dense<0.000000e+00> : vector<8x128xf32>
    %2 = tpu.matmul %1, %0, %cst {dimension_numbers = #tpu.dot_dimension_numbers<[1], [0], [0], [1], [0, 0, 1, 1], [], []>} : vector<8x72xbf16>, vector<72x128xbf16>, vector<8x128xf32> -> vector<8x128xf32>
    %c0_3 = arith.constant 0 : index
    %c0_4 = arith.constant 0 : index
    %3 = vector.load %arg3[%c0_3, %c0_4] : memref<8x1xf32, #tpu.memory_space<vmem>>, vector<8x1xf32>
    %4 = vector.broadcast %3 : vector<8x1xf32> to vector<8x128xf32>
    %5 = arith.addf %2, %4 : vector<8x128xf32>
    %c0_5 = arith.constant 0 : index
    %c0_6 = arith.constant 0 : index
    %6 = vector.load %arg4[%c0_5, %c0_6] : memref<8x128xf32, #tpu.memory_space<vmem>>, vector<8x128xf32>
    tpu.vector_store %arg4[%c0_5, %c0_6], %5 {strides = array<i32>} : memref<8x128xf32, #tpu.memory_space<vmem>>, vector<8x128xf32>,
    return
  }
  func.func @transform_0(%arg0: i32) -> (i32, i32) {
    %c0_i32 = arith.constant 0 : i32
    %c0_i32_0 = arith.constant 0 : i32
    %c0_i32_1 = arith.constant 0 : i32
    return %c0_i32, %c0_i32_0 : i32, i32
  }
  func.func @transform_1(%arg0: i32) -> (i32, i32) {
    %c0_i32 = arith.constant 0 : i32
    %c0_i32_0 = arith.constant 0 : i32
    return %c0_i32, %arg0 : i32, i32
  }
  func.func @transform_2(%arg0: i32) -> (i32, i32) {
    %c0_i32 = arith.constant 0 : i32
    %c0_i32_0 = arith.constant 0 : i32
    %c0_i32_1 = arith.constant 0 : i32
    return %c0_i32, %c0_i32_0 : i32, i32
  }
  func.func @transform_3(%arg0: i32) -> (i32, i32) {
    %c0_i32 = arith.constant 0 : i32
    %c0_i32_0 = arith.constant 0 : i32
    return %c0_i32, %arg0 : i32, i32
  }
}

module attributes {stable_mosaic.version = 11 : i64} {
  func.func @_matmul_kernel(%arg0: i32, %arg1: memref<32x72xbf16, #tpu.memory_space<vmem>>, %arg2: memref<72x128xbf16, #tpu.memory_space<vmem>>, %arg3: memref<32x1xf32, #tpu.memory_space<vmem>>, %arg4: memref<32x128xf32, #tpu.memory_space<vmem>>) attributes {dimension_semantics = [#tpu.dimension_semantics<parallel>], iteration_bounds = array<i64: 1>, scalar_prefetch = 0 : i64, scratch_operands = 0 : i64, tpu.core_type = #tpu.core_type<tc>, window_params = [{pipeline_mode = #tpu.pipeline_mode<synchronous>, transform_indices = @transform_0, window_bounds = array<i64: 32, 72>}, {transform_indices = @transform_1, window_bounds = array<i64: 72, 128>}, {pipeline_mode = #tpu.pipeline_mode<synchronous>, transform_indices = @transform_2, window_bounds = array<i64: 32, 1>}, {transform_indices = @transform_3, window_bounds = array<i64: 32, 128>}]} {
    %c0 = arith.constant 0 : index
    %c0_0 = arith.constant 0 : index
    %0 = vector.load %arg2[%c0, %c0_0] : memref<72x128xbf16, #tpu.memory_space<vmem>>, vector<72x128xbf16>
    %c0_1 = arith.constant 0 : index
    %c0_2 = arith.constant 0 : index
    %1 = vector.load %arg1[%c0_1, %c0_2] : memref<32x72xbf16, #tpu.memory_space<vmem>>, vector<32x72xbf16>
    %cst = arith.constant dense<0.000000e+00> : vector<32x128xf32>
    %2 = tpu.matmul %1, %0, %cst {dimension_numbers = #tpu.dot_dimension_numbers<[1], [0], [0], [1], [0, 0, 1, 1], [], []>} : vector<32x72xbf16>, vector<72x128xbf16>, vector<32x128xf32> -> vector<32x128xf32>
    %c0_3 = arith.constant 0 : index
    %c0_4 = arith.constant 0 : index
    %3 = vector.load %arg3[%c0_3, %c0_4] : memref<32x1xf32, #tpu.memory_space<vmem>>, vector<32x1xf32>
    %4 = vector.broadcast %3 : vector<32x1xf32> to vector<32x128xf32>
    %5 = arith.addf %2, %4 : vector<32x128xf32>
    %c0_5 = arith.constant 0 : index
    %c0_6 = arith.constant 0 : index
    %6 = vector.load %arg4[%c0_5, %c0_6] : memref<32x128xf32, #tpu.memory_space<vmem>>, vector<32x128xf32>
    tpu.vector_store %arg4[%c0_5, %c0_6], %5 {strides = array<i32>} : memref<32x128xf32, #tpu.memory_space<vmem>>, vector<32x128xf32>,
    return
  }
  func.func @transform_0(%arg0: i32) -> (i32, i32) {
    %c0_i32 = arith.constant 0 : i32
    %c0_i32_0 = arith.constant 0 : i32
    %c0_i32_1 = arith.constant 0 : i32
    return %c0_i32, %c0_i32_0 : i32, i32
  }
  func.func @transform_1(%arg0: i32) -> (i32, i32) {
    %c0_i32 = arith.constant 0 : i32
    %c0_i32_0 = arith.constant 0 : i32
    return %c0_i32, %arg0 : i32, i32
  }
  func.func @transform_2(%arg0: i32) -> (i32, i32) {
    %c0_i32 = arith.constant 0 : i32
    %c0_i32_0 = arith.constant 0 : i32
    %c0_i32_1 = arith.constant 0 : i32
    return %c0_i32, %c0_i32_0 : i32, i32
  }
  func.func @transform_3(%arg0: i32) -> (i32, i32) {
    %c0_i32 = arith.constant 0 : i32
    %c0_i32_0 = arith.constant 0 : i32
    return %c0_i32, %arg0 : i32, i32
  }
}

module attributes {stable_mosaic.version = 11 : i64} {
  func.func @_add_ln_mish_kernel(%arg0: i32, %arg1: memref<32x64xf32, #tpu.memory_space<vmem>>, %arg2: memref<32x64xf32, #tpu.memory_space<vmem>>, %arg3: memref<1x64xf32, #tpu.memory_space<vmem>>, %arg4: memref<1x64xf32, #tpu.memory_space<vmem>>, %arg5: memref<32x64xf32, #tpu.memory_space<vmem>>, %arg6: memref<32x64xf32, #tpu.memory_space<vmem>>) attributes {dimension_semantics = [#tpu.dimension_semantics<parallel>], iteration_bounds = array<i64: 1>, scalar_prefetch = 0 : i64, scratch_operands = 0 : i64, tpu.core_type = #tpu.core_type<tc>, window_params = [{transform_indices = @transform_0, window_bounds = array<i64: 32, 64>}, {transform_indices = @transform_1, window_bounds = array<i64: 32, 64>}, {pipeline_mode = #tpu.pipeline_mode<synchronous>, transform_indices = @transform_2, window_bounds = array<i64: 1, 64>}, {pipeline_mode = #tpu.pipeline_mode<synchronous>, transform_indices = @transform_3, window_bounds = array<i64: 1, 64>}, {transform_indices = @transform_4, window_bounds = array<i64: 32, 64>}, {transform_indices = @transform_5, window_bounds = array<i64: 32, 64>}]} {
    %c0 = arith.constant 0 : index
    %c0_0 = arith.constant 0 : index
    %0 = vector.load %arg1[%c0, %c0_0] : memref<32x64xf32, #tpu.memory_space<vmem>>, vector<32x64xf32>
    %c0_1 = arith.constant 0 : index
    %c0_2 = arith.constant 0 : index
    %1 = vector.load %arg2[%c0_1, %c0_2] : memref<32x64xf32, #tpu.memory_space<vmem>>, vector<32x64xf32>
    %2 = arith.addf %0, %1 : vector<32x64xf32>
    %cst = arith.constant dense<0.000000e+00> : vector<32xf32>
    %3 = vector.multi_reduction <add>, %2, %cst [1] : vector<32x64xf32> to vector<32xf32>
    %4 = vector.shape_cast %3 : vector<32xf32> to vector<32x1xf32>
    %cst_3 = arith.constant 6.400000e+01 : f32
    %5 = vector.broadcast %cst_3 : f32 to vector<32x1xf32>
    %6 = arith.divf %4, %5 : vector<32x1xf32>
    %7 = vector.broadcast %6 : vector<32x1xf32> to vector<32x64xf32>
    %8 = arith.subf %2, %7 : vector<32x64xf32>
    %9 = arith.mulf %8, %8 : vector<32x64xf32>
    %cst_4 = arith.constant dense<0.000000e+00> : vector<32xf32>
    %10 = vector.multi_reduction <add>, %9, %cst_4 [1] : vector<32x64xf32> to vector<32xf32>
    %11 = vector.shape_cast %10 : vector<32xf32> to vector<32x1xf32>
    %cst_5 = arith.constant 6.400000e+01 : f32
    %12 = vector.broadcast %cst_5 : f32 to vector<32x1xf32>
    %13 = arith.divf %11, %12 : vector<32x1xf32>
    %14 = vector.broadcast %6 : vector<32x1xf32> to vector<32x64xf32>
    %15 = arith.subf %2, %14 : vector<32x64xf32>
    %cst_6 = arith.constant 9.99999974E-6 : f32
    %16 = vector.broadcast %cst_6 : f32 to vector<32x1xf32>
    %17 = arith.addf %13, %16 : vector<32x1xf32>
    %18 = math.rsqrt %17 : vector<32x1xf32>
    %19 = vector.broadcast %18 : vector<32x1xf32> to vector<32x64xf32>
    %20 = arith.mulf %15, %19 : vector<32x64xf32>
    %c0_7 = arith.constant 0 : index
    %c0_8 = arith.constant 0 : index
    %21 = vector.load %arg3[%c0_7, %c0_8] : memref<1x64xf32, #tpu.memory_space<vmem>>, vector<1x64xf32>
    %22 = vector.broadcast %21 : vector<1x64xf32> to vector<32x64xf32>
    %23 = arith.mulf %20, %22 : vector<32x64xf32>
    %c0_9 = arith.constant 0 : index
    %c0_10 = arith.constant 0 : index
    %24 = vector.load %arg4[%c0_9, %c0_10] : memref<1x64xf32, #tpu.memory_space<vmem>>, vector<1x64xf32>
    %25 = vector.broadcast %24 : vector<1x64xf32> to vector<32x64xf32>
    %26 = arith.addf %23, %25 : vector<32x64xf32>
    %cst_11 = arith.constant 2.000000e+01 : f32
    %27 = vector.broadcast %cst_11 : f32 to vector<32x64xf32>
    %28 = arith.minimumf %26, %27 : vector<32x64xf32>
    %29 = math.exp %28 : vector<32x64xf32>
    %cst_12 = arith.constant 1.000000e+00 : f32
    %30 = vector.broadcast %cst_12 : f32 to vector<32x64xf32>
    %31 = arith.addf %30, %29 : vector<32x64xf32>
    %cst_13 = arith.constant 1.000000e+00 : f32
    %32 = vector.broadcast %cst_13 : f32 to vector<32x64xf32>
    %33 = arith.addf %32, %29 : vector<32x64xf32>
    %34 = arith.mulf %31, %33 : vector<32x64xf32>
    %cst_14 = arith.constant 1.000000e+00 : f32
    %35 = vector.broadcast %cst_14 : f32 to vector<32x64xf32>
    %36 = arith.subf %34, %35 : vector<32x64xf32>
    %37 = arith.mulf %26, %36 : vector<32x64xf32>
    %cst_15 = arith.constant 1.000000e+00 : f32
    %38 = vector.broadcast %cst_15 : f32 to vector<32x64xf32>
    %39 = arith.addf %34, %38 : vector<32x64xf32>
    %40 = tpu.reciprocal %39 {approx = true} : vector<32x64xf32> -> vector<32x64xf32>
    %41 = arith.mulf %37, %40 : vector<32x64xf32>
    %c0_16 = arith.constant 0 : index
    %c0_17 = arith.constant 0 : index
    %42 = vector.load %arg5[%c0_16, %c0_17] : memref<32x64xf32, #tpu.memory_space<vmem>>, vector<32x64xf32>
    %43 = arith.addf %41, %42 : vector<32x64xf32>
    %c0_18 = arith.constant 0 : index
    %c0_19 = arith.constant 0 : index
    %44 = vector.load %arg6[%c0_18, %c0_19] : memref<32x64xf32, #tpu.memory_space<vmem>>, vector<32x64xf32>
    tpu.vector_store %arg6[%c0_18, %c0_19], %43 {strides = array<i32>} : memref<32x64xf32, #tpu.memory_space<vmem>>, vector<32x64xf32>,
    return
  }
  func.func @transform_0(%arg0: i32) -> (i32, i32) {
    %c0_i32 = arith.constant 0 : i32
    %c0_i32_0 = arith.constant 0 : i32
    return %arg0, %c0_i32 : i32, i32
  }
  func.func @transform_1(%arg0: i32) -> (i32, i32) {
    %c0_i32 = arith.constant 0 : i32
    %c0_i32_0 = arith.constant 0 : i32
    return %arg0, %c0_i32 : i32, i32
  }
  func.func @transform_2(%arg0: i32) -> (i32, i32) {
    %c0_i32 = arith.constant 0 : i32
    %c0_i32_0 = arith.constant 0 : i32
    %c0_i32_1 = arith.constant 0 : i32
    return %c0_i32, %c0_i32_0 : i32, i32
  }
  func.func @transform_3(%arg0: i32) -> (i32, i32) {
    %c0_i32 = arith.constant 0 : i32
    %c0_i32_0 = arith.constant 0 : i32
    %c0_i32_1 = arith.constant 0 : i32
    return %c0_i32, %c0_i32_0 : i32, i32
  }
  func.func @transform_4(%arg0: i32) -> (i32, i32) {
    %c0_i32 = arith.constant 0 : i32
    %c0_i32_0 = arith.constant 0 : i32
    return %arg0, %c0_i32 : i32, i32
  }
  func.func @transform_5(%arg0: i32) -> (i32, i32) {
    %c0_i32 = arith.constant 0 : i32
    %c0_i32_0 = arith.constant 0 : i32
    return %arg0, %c0_i32 : i32, i32
  }
}

module attributes {stable_mosaic.version = 11 : i64} {
  func.func @_matmul_kernel(%arg0: i32, %arg1: memref<8x8xbf16, #tpu.memory_space<vmem>>, %arg2: memref<8x128xbf16, #tpu.memory_space<vmem>>, %arg3: memref<8x1xf32, #tpu.memory_space<vmem>>, %arg4: memref<8x128xf32, #tpu.memory_space<vmem>>) attributes {dimension_semantics = [#tpu.dimension_semantics<parallel>], iteration_bounds = array<i64: 1>, scalar_prefetch = 0 : i64, scratch_operands = 0 : i64, tpu.core_type = #tpu.core_type<tc>, window_params = [{pipeline_mode = #tpu.pipeline_mode<synchronous>, transform_indices = @transform_0, window_bounds = array<i64: 8, 8>}, {transform_indices = @transform_1, window_bounds = array<i64: 8, 128>}, {pipeline_mode = #tpu.pipeline_mode<synchronous>, transform_indices = @transform_2, window_bounds = array<i64: 8, 1>}, {transform_indices = @transform_3, window_bounds = array<i64: 8, 128>}]} {
    %c0 = arith.constant 0 : index
    %c0_0 = arith.constant 0 : index
    %0 = vector.load %arg2[%c0, %c0_0] : memref<8x128xbf16, #tpu.memory_space<vmem>>, vector<8x128xbf16>
    %c0_1 = arith.constant 0 : index
    %c0_2 = arith.constant 0 : index
    %1 = vector.load %arg1[%c0_1, %c0_2] : memref<8x8xbf16, #tpu.memory_space<vmem>>, vector<8x8xbf16>
    %cst = arith.constant dense<0.000000e+00> : vector<8x128xf32>
    %2 = tpu.matmul %1, %0, %cst {dimension_numbers = #tpu.dot_dimension_numbers<[1], [0], [0], [1], [0, 0, 1, 1], [], []>} : vector<8x8xbf16>, vector<8x128xbf16>, vector<8x128xf32> -> vector<8x128xf32>
    %c0_3 = arith.constant 0 : index
    %c0_4 = arith.constant 0 : index
    %3 = vector.load %arg3[%c0_3, %c0_4] : memref<8x1xf32, #tpu.memory_space<vmem>>, vector<8x1xf32>
    %4 = vector.broadcast %3 : vector<8x1xf32> to vector<8x128xf32>
    %5 = arith.addf %2, %4 : vector<8x128xf32>
    %cst_5 = arith.constant 0.000000e+00 : f32
    %6 = vector.broadcast %cst_5 : f32 to vector<8x128xf32>
    %7 = arith.maximumf %5, %6 : vector<8x128xf32>
    %c0_6 = arith.constant 0 : index
    %c0_7 = arith.constant 0 : index
    %8 = vector.load %arg4[%c0_6, %c0_7] : memref<8x128xf32, #tpu.memory_space<vmem>>, vector<8x128xf32>
    tpu.vector_store %arg4[%c0_6, %c0_7], %7 {strides = array<i32>} : memref<8x128xf32, #tpu.memory_space<vmem>>, vector<8x128xf32>,
    return
  }
  func.func @transform_0(%arg0: i32) -> (i32, i32) {
    %c0_i32 = arith.constant 0 : i32
    %c0_i32_0 = arith.constant 0 : i32
    %c0_i32_1 = arith.constant 0 : i32
    return %c0_i32, %c0_i32_0 : i32, i32
  }
  func.func @transform_1(%arg0: i32) -> (i32, i32) {
    %c0_i32 = arith.constant 0 : i32
    %c0_i32_0 = arith.constant 0 : i32
    return %c0_i32, %arg0 : i32, i32
  }
  func.func @transform_2(%arg0: i32) -> (i32, i32) {
    %c0_i32 = arith.constant 0 : i32
    %c0_i32_0 = arith.constant 0 : i32
    %c0_i32_1 = arith.constant 0 : i32
    return %c0_i32, %c0_i32_0 : i32, i32
  }
  func.func @transform_3(%arg0: i32) -> (i32, i32) {
    %c0_i32 = arith.constant 0 : i32
    %c0_i32_0 = arith.constant 0 : i32
    return %c0_i32, %arg0 : i32, i32
  }
}

module attributes {stable_mosaic.version = 11 : i64} {
  func.func @_matmul_kernel(%arg0: i32, %arg1: memref<16x16xbf16, #tpu.memory_space<vmem>>, %arg2: memref<16x24xbf16, #tpu.memory_space<vmem>>, %arg3: memref<16x1xf32, #tpu.memory_space<vmem>>, %arg4: memref<16x24xf32, #tpu.memory_space<vmem>>) attributes {dimension_semantics = [#tpu.dimension_semantics<parallel>], iteration_bounds = array<i64: 1>, scalar_prefetch = 0 : i64, scratch_operands = 0 : i64, tpu.core_type = #tpu.core_type<tc>, window_params = [{pipeline_mode = #tpu.pipeline_mode<synchronous>, transform_indices = @transform_0, window_bounds = array<i64: 16, 16>}, {transform_indices = @transform_1, window_bounds = array<i64: 16, 24>}, {pipeline_mode = #tpu.pipeline_mode<synchronous>, transform_indices = @transform_2, window_bounds = array<i64: 16, 1>}, {transform_indices = @transform_3, window_bounds = array<i64: 16, 24>}]} {
    %c0 = arith.constant 0 : index
    %c0_0 = arith.constant 0 : index
    %0 = vector.load %arg2[%c0, %c0_0] : memref<16x24xbf16, #tpu.memory_space<vmem>>, vector<16x24xbf16>
    %c0_1 = arith.constant 0 : index
    %c0_2 = arith.constant 0 : index
    %1 = vector.load %arg1[%c0_1, %c0_2] : memref<16x16xbf16, #tpu.memory_space<vmem>>, vector<16x16xbf16>
    %cst = arith.constant dense<0.000000e+00> : vector<16x24xf32>
    %2 = tpu.matmul %1, %0, %cst {dimension_numbers = #tpu.dot_dimension_numbers<[1], [0], [0], [1], [0, 0, 1, 1], [], []>} : vector<16x16xbf16>, vector<16x24xbf16>, vector<16x24xf32> -> vector<16x24xf32>
    %c0_3 = arith.constant 0 : index
    %c0_4 = arith.constant 0 : index
    %3 = vector.load %arg3[%c0_3, %c0_4] : memref<16x1xf32, #tpu.memory_space<vmem>>, vector<16x1xf32>
    %4 = vector.broadcast %3 : vector<16x1xf32> to vector<16x24xf32>
    %5 = arith.addf %2, %4 : vector<16x24xf32>
    %cst_5 = arith.constant 0.000000e+00 : f32
    %6 = vector.broadcast %cst_5 : f32 to vector<16x24xf32>
    %7 = arith.maximumf %5, %6 : vector<16x24xf32>
    %c0_6 = arith.constant 0 : index
    %c0_7 = arith.constant 0 : index
    %8 = vector.load %arg4[%c0_6, %c0_7] : memref<16x24xf32, #tpu.memory_space<vmem>>, vector<16x24xf32>
    tpu.vector_store %arg4[%c0_6, %c0_7], %7 {strides = array<i32>} : memref<16x24xf32, #tpu.memory_space<vmem>>, vector<16x24xf32>,
    return
  }
  func.func @transform_0(%arg0: i32) -> (i32, i32) {
    %c0_i32 = arith.constant 0 : i32
    %c0_i32_0 = arith.constant 0 : i32
    %c0_i32_1 = arith.constant 0 : i32
    return %c0_i32, %c0_i32_0 : i32, i32
  }
  func.func @transform_1(%arg0: i32) -> (i32, i32) {
    %c0_i32 = arith.constant 0 : i32
    %c0_i32_0 = arith.constant 0 : i32
    return %c0_i32, %arg0 : i32, i32
  }
  func.func @transform_2(%arg0: i32) -> (i32, i32) {
    %c0_i32 = arith.constant 0 : i32
    %c0_i32_0 = arith.constant 0 : i32
    %c0_i32_1 = arith.constant 0 : i32
    return %c0_i32, %c0_i32_0 : i32, i32
  }
  func.func @transform_3(%arg0: i32) -> (i32, i32) {
    %c0_i32 = arith.constant 0 : i32
    %c0_i32_0 = arith.constant 0 : i32
    return %c0_i32, %arg0 : i32, i32
  }
}

module attributes {stable_mosaic.version = 11 : i64} {
  func.func @_matmul_kernel(%arg0: i32, %arg1: memref<16x16xbf16, #tpu.memory_space<vmem>>, %arg2: memref<16x80xbf16, #tpu.memory_space<vmem>>, %arg3: memref<16x1xf32, #tpu.memory_space<vmem>>, %arg4: memref<16x80xf32, #tpu.memory_space<vmem>>) attributes {dimension_semantics = [#tpu.dimension_semantics<parallel>], iteration_bounds = array<i64: 1>, scalar_prefetch = 0 : i64, scratch_operands = 0 : i64, tpu.core_type = #tpu.core_type<tc>, window_params = [{pipeline_mode = #tpu.pipeline_mode<synchronous>, transform_indices = @transform_0, window_bounds = array<i64: 16, 16>}, {transform_indices = @transform_1, window_bounds = array<i64: 16, 80>}, {pipeline_mode = #tpu.pipeline_mode<synchronous>, transform_indices = @transform_2, window_bounds = array<i64: 16, 1>}, {transform_indices = @transform_3, window_bounds = array<i64: 16, 80>}]} {
    %c0 = arith.constant 0 : index
    %c0_0 = arith.constant 0 : index
    %0 = vector.load %arg2[%c0, %c0_0] : memref<16x80xbf16, #tpu.memory_space<vmem>>, vector<16x80xbf16>
    %c0_1 = arith.constant 0 : index
    %c0_2 = arith.constant 0 : index
    %1 = vector.load %arg1[%c0_1, %c0_2] : memref<16x16xbf16, #tpu.memory_space<vmem>>, vector<16x16xbf16>
    %cst = arith.constant dense<0.000000e+00> : vector<16x80xf32>
    %2 = tpu.matmul %1, %0, %cst {dimension_numbers = #tpu.dot_dimension_numbers<[1], [0], [0], [1], [0, 0, 1, 1], [], []>} : vector<16x16xbf16>, vector<16x80xbf16>, vector<16x80xf32> -> vector<16x80xf32>
    %c0_3 = arith.constant 0 : index
    %c0_4 = arith.constant 0 : index
    %3 = vector.load %arg3[%c0_3, %c0_4] : memref<16x1xf32, #tpu.memory_space<vmem>>, vector<16x1xf32>
    %4 = vector.broadcast %3 : vector<16x1xf32> to vector<16x80xf32>
    %5 = arith.addf %2, %4 : vector<16x80xf32>
    %cst_5 = arith.constant 0.000000e+00 : f32
    %6 = vector.broadcast %cst_5 : f32 to vector<16x80xf32>
    %7 = arith.maximumf %5, %6 : vector<16x80xf32>
    %c0_6 = arith.constant 0 : index
    %c0_7 = arith.constant 0 : index
    %8 = vector.load %arg4[%c0_6, %c0_7] : memref<16x80xf32, #tpu.memory_space<vmem>>, vector<16x80xf32>
    tpu.vector_store %arg4[%c0_6, %c0_7], %7 {strides = array<i32>} : memref<16x80xf32, #tpu.memory_space<vmem>>, vector<16x80xf32>,
    return
  }
  func.func @transform_0(%arg0: i32) -> (i32, i32) {
    %c0_i32 = arith.constant 0 : i32
    %c0_i32_0 = arith.constant 0 : i32
    %c0_i32_1 = arith.constant 0 : i32
    return %c0_i32, %c0_i32_0 : i32, i32
  }
  func.func @transform_1(%arg0: i32) -> (i32, i32) {
    %c0_i32 = arith.constant 0 : i32
    %c0_i32_0 = arith.constant 0 : i32
    return %c0_i32, %arg0 : i32, i32
  }
  func.func @transform_2(%arg0: i32) -> (i32, i32) {
    %c0_i32 = arith.constant 0 : i32
    %c0_i32_0 = arith.constant 0 : i32
    %c0_i32_1 = arith.constant 0 : i32
    return %c0_i32, %c0_i32_0 : i32, i32
  }
  func.func @transform_3(%arg0: i32) -> (i32, i32) {
    %c0_i32 = arith.constant 0 : i32
    %c0_i32_0 = arith.constant 0 : i32
    return %c0_i32, %arg0 : i32, i32
  }
}

module attributes {stable_mosaic.version = 11 : i64} {
  func.func @_matmul_kernel(%arg0: i32, %arg1: memref<16x8xbf16, #tpu.memory_space<vmem>>, %arg2: memref<8x128xf32, #tpu.memory_space<vmem>>, %arg3: memref<8x128xf32, #tpu.memory_space<vmem>>, %arg4: memref<8x128xf32, #tpu.memory_space<vmem>>, %arg5: memref<16x1xf32, #tpu.memory_space<vmem>>, %arg6: memref<16x128xf32, #tpu.memory_space<vmem>>) attributes {dimension_semantics = [#tpu.dimension_semantics<parallel>], iteration_bounds = array<i64: 1>, scalar_prefetch = 0 : i64, scratch_operands = 0 : i64, tpu.core_type = #tpu.core_type<tc>, window_params = [{pipeline_mode = #tpu.pipeline_mode<synchronous>, transform_indices = @transform_0, window_bounds = array<i64: 16, 8>}, {transform_indices = @transform_1, window_bounds = array<i64: 8, 128>}, {transform_indices = @transform_2, window_bounds = array<i64: 8, 128>}, {transform_indices = @transform_3, window_bounds = array<i64: 8, 128>}, {pipeline_mode = #tpu.pipeline_mode<synchronous>, transform_indices = @transform_4, window_bounds = array<i64: 16, 1>}, {transform_indices = @transform_5, window_bounds = array<i64: 16, 128>}]} {
    %c0 = arith.constant 0 : index
    %c0_0 = arith.constant 0 : index
    %0 = vector.load %arg2[%c0, %c0_0] : memref<8x128xf32, #tpu.memory_space<vmem>>, vector<8x128xf32>
    %c0_1 = arith.constant 0 : index
    %c0_2 = arith.constant 0 : index
    %1 = vector.load %arg3[%c0_1, %c0_2] : memref<8x128xf32, #tpu.memory_space<vmem>>, vector<8x128xf32>
    %2 = arith.addf %0, %1 : vector<8x128xf32>
    %c0_3 = arith.constant 0 : index
    %c0_4 = arith.constant 0 : index
    %3 = vector.load %arg4[%c0_3, %c0_4] : memref<8x128xf32, #tpu.memory_space<vmem>>, vector<8x128xf32>
    %4 = arith.addf %2, %3 : vector<8x128xf32>
    %c0_5 = arith.constant 0 : index
    %c0_6 = arith.constant 0 : index
    %5 = vector.load %arg1[%c0_5, %c0_6] : memref<16x8xbf16, #tpu.memory_space<vmem>>, vector<16x8xbf16>
    %6 = arith.truncf %4 : vector<8x128xf32> to vector<8x128xbf16>
    %cst = arith.constant dense<0.000000e+00> : vector<16x128xf32>
    %7 = tpu.matmul %5, %6, %cst {dimension_numbers = #tpu.dot_dimension_numbers<[1], [0], [0], [1], [0, 0, 1, 1], [], []>} : vector<16x8xbf16>, vector<8x128xbf16>, vector<16x128xf32> -> vector<16x128xf32>
    %c0_7 = arith.constant 0 : index
    %c0_8 = arith.constant 0 : index
    %8 = vector.load %arg5[%c0_7, %c0_8] : memref<16x1xf32, #tpu.memory_space<vmem>>, vector<16x1xf32>
    %9 = vector.broadcast %8 : vector<16x1xf32> to vector<16x128xf32>
    %10 = arith.addf %7, %9 : vector<16x128xf32>
    %c0_9 = arith.constant 0 : index
    %c0_10 = arith.constant 0 : index
    %11 = vector.load %arg6[%c0_9, %c0_10] : memref<16x128xf32, #tpu.memory_space<vmem>>, vector<16x128xf32>
    tpu.vector_store %arg6[%c0_9, %c0_10], %10 {strides = array<i32>} : memref<16x128xf32, #tpu.memory_space<vmem>>, vector<16x128xf32>,
    return
  }
  func.func @transform_0(%arg0: i32) -> (i32, i32) {
    %c0_i32 = arith.constant 0 : i32
    %c0_i32_0 = arith.constant 0 : i32
    %c0_i32_1 = arith.constant 0 : i32
    return %c0_i32, %c0_i32_0 : i32, i32
  }
  func.func @transform_1(%arg0: i32) -> (i32, i32) {
    %c0_i32 = arith.constant 0 : i32
    %c0_i32_0 = arith.constant 0 : i32
    return %c0_i32, %arg0 : i32, i32
  }
  func.func @transform_2(%arg0: i32) -> (i32, i32) {
    %c0_i32 = arith.constant 0 : i32
    %c0_i32_0 = arith.constant 0 : i32
    return %c0_i32, %arg0 : i32, i32
  }
  func.func @transform_3(%arg0: i32) -> (i32, i32) {
    %c0_i32 = arith.constant 0 : i32
    %c0_i32_0 = arith.constant 0 : i32
    return %c0_i32, %arg0 : i32, i32
  }
  func.func @transform_4(%arg0: i32) -> (i32, i32) {
    %c0_i32 = arith.constant 0 : i32
    %c0_i32_0 = arith.constant 0 : i32
    %c0_i32_1 = arith.constant 0 : i32
    return %c0_i32, %c0_i32_0 : i32, i32
  }
  func.func @transform_5(%arg0: i32) -> (i32, i32) {
    %c0_i32 = arith.constant 0 : i32
    %c0_i32_0 = arith.constant 0 : i32
    return %c0_i32, %arg0 : i32, i32
  }
}

</mosaic_0001>

<bundles_post_ra>
// kernel: fwd.20
= control target key start
LH: loop header
LB: loop body
LE: loop exit
PB: predicated region body
PF: predicated region fallthrough
CT: control target
= control target key end

     0   :  { %vm27_vm0 = vcmask 1043456   ;;  %v90_v0 = vmov 0.0   ;;  %vm91_vm1 = vmmov 0   ;;  %v92_v3 = vmov 0   ;;  %s125_s1 = inlined_call_operand.vmem [shape: bf16[8,128], index: 1, kind: input, shape index: {}]   ;;  %s126_s0 = inlined_call_operand.vmem [shape: bf16[4,8], index: 0, kind: input, shape index: {}]   ;;  %s127_s2 = inlined_call_operand.vmem [shape: f32[4,1], index: 2, kind: input, shape index: {}]   ;;  %s128_s3 = inlined_call_operand.vmem [shape: f32[4,128], index: 3, kind: output, shape index: {}]  }
   0x1   :  { %80 = vmatprep.subr.bf16.mxu0 %v90_v0  ;;  %v15_v1 = vld [vmem:[%s125_s1] sm:$0xf]  ;;  %82 = vmatprep.mubr.msk.bf16.mxu0 %vm91_vm1, %v90_v0  ;;  %vm23_vm2 = vcmask 64512  }
   0x2   :  { %v29_v2 = vsel %vm27_vm0, %v15_v1, 0  ;;  %89 = vset.pattern.permute.xlu0 %v92_v3  ;;  %v17_v4 = vld [vmem:[%s127_s2] sm:$0xf] }
   0x3   :  { %81 = vmatpush3.bf16.msra.mxu0 %v29_v2  ;;  %v16_v5 = vld [vmem:[%s126_s0] sm:$0x3]  ;;  %20 = vperm.xlu0 %89, %v17_v4  }
   0x6   :  { %83 = vmatmul.mubr.msk.bf16.vlgmr.msra.gmra.mrb[0].mxu0 %vm23_vm2, %v16_v5 }
  0x82   :  { %v21_v6 = vpop.permute.xlu0 %20 }
  0xd9   :  { %v65_v7 = vpop.f32.mrb[0].mxu0 }
  0xda   :  { %v66_v8 = vadd.f32 %v65_v7, %v21_v6  ;;  %v84_v9 = vpop.f32.mrb[1].mxu0 }
  0xdb   :  { %v68_v10 = vpop.f32.mrb[2].mxu0 }
  0xdc   :  { %v71_v11 = vmax.f32 %v66_v8, 0.0  ;;  %v85_v12 = vpop.f32.mrb[3].mxu0 }
  0xde   :  { %72 = vst [vmem:[%s128_s3] sm:$0xf] %v71_v11 }

// kernel: fwd.22
= control target key start
LH: loop header
LB: loop body
LE: loop exit
PB: predicated region body
PF: predicated region fallthrough
CT: control target
= control target key end

     0   :  { %vm27_vm0 = vcmask 1043456   ;;  %v91_v0 = vmov 0.0   ;;  %vm92_vm1 = vmmov 0   ;;  %v93_v4 = vmov 0   ;;  %s126_s1 = inlined_call_operand.vmem [shape: bf16[8,24], index: 1, kind: input, shape index: {}]   ;;  %s127_s0 = inlined_call_operand.vmem [shape: bf16[8,8], index: 0, kind: input, shape index: {}]   ;;  %s128_s2 = inlined_call_operand.vmem [shape: f32[8,1], index: 2, kind: input, shape index: {}]   ;;  %s129_s3 = inlined_call_operand.vmem [shape: f32[8,24], index: 3, kind: output, shape index: {}]  }
   0x1   :  { %81 = vmatprep.subr.bf16.mxu0 %v91_v0  ;;  %v15_v1 = vld [vmem:[%s126_s1] sm:$0xf]  ;;  %83 = vmatprep.mubr.msk.bf16.mxu0 %vm92_vm1, %v91_v0  ;;  %vm23_vm2 = vcmask 64512   ;;  %vm72_vm3 = vcmask 195584  }
   0x2   :  { %v17_v2 = vld [vmem:[%s128_s2] sm:$0xff]  ;;  %v29_v3 = vsel %vm27_vm0, %v15_v1, 0  ;;  %90 = vset.pattern.permute.xlu0 %v93_v4 }
   0x3   :  { %82 = vmatpush3.bf16.msra.mxu0 %v29_v3  ;;  %v16_v5 = vld [vmem:[%s127_s0] sm:$0xf]  ;;  %20 = vperm.xlu0 %90, %v17_v2  }
   0x6   :  { %84 = vmatmul.mubr.msk.bf16.vlgmr.msra.gmra.mrb[0].mxu0 %vm23_vm2, %v16_v5 }
  0x82   :  { %v21_v6 = vpop.permute.xlu0 %20 }
  0xd9   :  { %v65_v7 = vpop.f32.mrb[0].mxu0 }
  0xda   :  { %v66_v8 = vadd.f32 %v65_v7, %v21_v6  ;;  %v85_v9 = vpop.f32.mrb[1].mxu0 }
  0xdb   :  { %v68_v10 = vpop.f32.mrb[2].mxu0 }
  0xdc   :  { %v71_v11 = vmax.f32 %v66_v8, 0.0  ;;  %v86_v12 = vpop.f32.mrb[3].mxu0 }
  0xde   :  { %73 = vst.msk [vmem:[%s129_s3] sm:$0xff] %vm72_vm3, %v71_v11 }

// kernel: tile.14
= control target key start
LH: loop header
LB: loop body
LE: loop exit
PB: predicated region body
PF: predicated region fallthrough
CT: control target
= control target key end

     0   :  { %vm323_vm0 = vcmask 1041409   ;;  %vm327_vm1 = vcmask 1042434   ;;  %vm331_vm2 = vcmask 1043459   ;;  %s1055_s13 = smov 124   ;;  %s1056_s14 = smov 116   ;;  %vm333_vm3 = vcmask 31744   ;;  %s1387_s0 = inlined_call_operand.vmem [shape: f32[4,2,2,4,2,4], index: 0, kind: input, shape index: {}]   ;;  %s1388_s1 = inlined_call_operand.vmem [shape: f32[4,128], index: 1, kind: output, shape index: {}]  }
   0x1   :  { %v961_v0 = vld [vmem:[%s1387_s0 + $0x7e] sm:$0x3]  ;;  %v962_v4 = vld [vmem:[%s1387_s0 + $0x7c] sm:$0x3]  ;;  %v963_v8 = vld [vmem:[%s1387_s0 + $0x7a] sm:$0x3] }
   0x2   :  { %v977_v1 = vld [vmem:[%s1387_s0 + $0x5e] sm:$0x3]  ;;  %8 = vst [vmem:[#allocation1 + $0x1f8] sm:$0x3] %v961_v0  ;;  %v978_v5 = vld [vmem:[%s1387_s0 + $0x5c] sm:$0x3] }
   0x3   :  { %v993_v2 = vld [vmem:[%s1387_s0 + $0x3e] sm:$0x3]  ;;  %88 = vst [vmem:[#allocation1 + $0x178] sm:$0x3] %v977_v1  ;;  %v994_v6 = vld [vmem:[%s1387_s0 + $0x3c] sm:$0x3] }
   0x4   :  { %168 = vst [vmem:[#allocation1 + $0xf8] sm:$0x3] %v993_v2  ;;  %v1009_v3 = vld [vmem:[%s1387_s0 + $0x1e] sm:$0x3]  ;;  %13 = vst [vmem:[#allocation1 + $0x1f0] sm:$0x3] %v962_v4 }
   0x5   :  { %248 = vst [vmem:[#allocation1 + $0x78] sm:$0x3] %v1009_v3  ;;  %93 = vst [vmem:[#allocation1 + $0x170] sm:$0x3] %v978_v5  ;;  %v1010_v7 = vld [vmem:[%s1387_s0 + $0x1c] sm:$0x3] }
   0x6   :  { %173 = vst [vmem:[#allocation1 + $0xf0] sm:$0x3] %v994_v6  ;;  %253 = vst [vmem:[#allocation1 + $0x70] sm:$0x3] %v1010_v7  ;;  %v979_v9 = vld [vmem:[%s1387_s0 + $0x5a] sm:$0x3] }
   0x7   :  { %18 = vst [vmem:[#allocation1 + $0x1e8] sm:$0x3] %v963_v8  ;;  %v995_v10 = vld [vmem:[%s1387_s0 + $0x3a] sm:$0x3]  ;;  %98 = vst [vmem:[#allocation1 + $0x168] sm:$0x3] %v979_v9 }
   0x8   :  { %178 = vst [vmem:[#allocation1 + $0xe8] sm:$0x3] %v995_v10  ;;  %v1011_v11 = vld [vmem:[%s1387_s0 + $0x1a] sm:$0x3]  ;;  %v964_v12 = vld [vmem:[%s1387_s0 + $0x78] sm:$0x3] }
   0x9   :  { %258 = vst [vmem:[#allocation1 + $0x68] sm:$0x3] %v1011_v11  ;;  %23 = vst [vmem:[#allocation1 + $0x1e0] sm:$0x3] %v964_v12  ;;  %v980_v13 = vld [vmem:[%s1387_s0 + $0x58] sm:$0x3] }
   0xa   :  { %v996_v14 = vld [vmem:[%s1387_s0 + $0x38] sm:$0x3]  ;;  %103 = vst [vmem:[#allocation1 + $0x160] sm:$0x3] %v980_v13  ;;  %v965_v16 = vld [vmem:[%s1387_s0 + $0x76] sm:$0x3] }
   0xb   :  { %v1012_v15 = vld [vmem:[%s1387_s0 + $0x18] sm:$0x3]  ;;  %183 = vst [vmem:[#allocation1 + $0xe0] sm:$0x3] %v996_v14  ;;  %v981_v17 = vld [vmem:[%s1387_s0 + $0x56] sm:$0x3] }
   0xc   :  { %263 = vst [vmem:[#allocation1 + $0x60] sm:$0x3] %v1012_v15  ;;  %v338_v18 = vld [vmem:[#allocation1 + $0xf8] sm:$0x2]   ;;  %28 = vst [vmem:[#allocation1 + $0x1d8] sm:$0x3] %v965_v16 }
   0xd   :  { %v342_v19 = vld [vmem:[#allocation1 + $0x177] sm:$0x4]   ;;  %108 = vst [vmem:[#allocation1 + $0x158] sm:$0x3] %v981_v17  ;;  %v354_v22 = vld [vmem:[#allocation1 + $0x78] sm:$0x1]  }
   0xe   :  { %v346_v20 = vld [vmem:[#allocation1 + $0x1f6] sm:$0x8]   ;;  %v356_v23 = vld [vmem:[#allocation1 + $0xf7] sm:$0x2]   ;;  %v374_v25 = vld [vmem:[#allocation1 + $0xf0] sm:$0x2]  }
   0xf   :  { %v336_v21 = vld [vmem:[#allocation1 + $0x79] sm:$0x1]   ;;  %v378_v26 = vld [vmem:[#allocation1 + $0x16f] sm:$0x4]   ;;  %v358_v28 = vsel %vm323_vm0, %v356_v23, %v354_v22  ;;  %v360_v31 = vld [vmem:[#allocation1 + $0x176] sm:$0x4]  }
  0x10   :  { %v340_v24 = vsel %vm323_vm0, %v338_v18, %v336_v21  ;;  %v382_v27 = vld [vmem:[#allocation1 + $0x1ee] sm:$0x8]   ;;  %v364_v32 = vld [vmem:[#allocation1 + $0x1f5] sm:$0x8]   ;;  %v362_v35 = vsel %vm327_vm1, %v360_v31, %v358_v28  ;;  %v390_v36 = vld [vmem:[#allocation1 + $0x70] sm:$0x1]  }
  0x11   :  { %v344_v29 = vsel %vm327_vm1, %v342_v19, %v340_v24  ;;  %v372_v30 = vld [vmem:[#allocation1 + $0x71] sm:$0x1]   ;;  %v392_v37 = vld [vmem:[#allocation1 + $0xef] sm:$0x2]   ;;  %v408_v42 = vld [vmem:[#allocation1 + $0x69] sm:$0x1]   ;;  %v366_v45 = vsel %vm331_vm2, %v364_v32, %v362_v35 }
  0x12   :  { %v348_v33 = vsel %vm331_vm2, %v346_v20, %v344_v29  ;;  %v376_v34 = vsel %vm323_vm0, %v374_v25, %v372_v30  ;;  %v396_v38 = vld [vmem:[#allocation1 + $0x16e] sm:$0x4]   ;;  %v394_v40 = vsel %vm323_vm0, %v392_v37, %v390_v36  ;;  %v410_v43 = vld [vmem:[#allocation1 + $0xe8] sm:$0x2]   ;;  %v426_v49 = vld [vmem:[#allocation1 + $0x68] sm:$0x1]  }
  0x13   :  { %349 = vrot.lane.b32.xlu0 %v348_v33, %s1055_s13  ;;  %v380_v39 = vsel %vm327_vm1, %v378_v26, %v376_v34  ;;  %v400_v41 = vld [vmem:[#allocation1 + $0x1ed] sm:$0x8]   ;;  %v398_v46 = vsel %vm327_vm1, %v396_v38, %v394_v40  ;;  %v412_v47 = vsel %vm323_vm0, %v410_v43, %v408_v42  ;;  %v414_v48 = vld [vmem:[#allocation1 + $0x167] sm:$0x4]   ;;  %v428_v52 = vld [vmem:[#allocation1 + $0xe7] sm:$0x2]  }
  0x14   :  { %v384_v44 = vsel %vm331_vm2, %v382_v27, %v380_v39  ;;  %v416_v50 = vsel %vm327_vm1, %v414_v48, %v412_v47  ;;  %v418_v51 = vld [vmem:[#allocation1 + $0x1e6] sm:$0x8]   ;;  %v432_v53 = vld [vmem:[#allocation1 + $0x166] sm:$0x4]   ;;  %v402_v54 = vsel %vm331_vm2, %v400_v41, %v398_v46  ;;  %v430_v55 = vsel %vm323_vm0, %v428_v52, %v426_v49  ;;  %v444_v56 = vld [vmem:[#allocation1 + $0x61] sm:$0x1]  }
  0x15   :  { %385 = vrot.lane.b32.xlu1 %v384_v44, %s1056_s14  ;;  %v446_v57 = vld [vmem:[#allocation1 + $0xe0] sm:$0x2]   ;;  %s1057_s15 = smov 120   ;;  %v434_v59 = vsel %vm327_vm1, %v432_v53, %v430_v55  ;;  %v436_v60 = vld [vmem:[#allocation1 + $0x1e5] sm:$0x8]   ;;  %v420_v0 = vsel %vm331_vm2, %v418_v51, %v416_v50  ;;  %s1058_s18 = smov 112  }
  0x16   :  { %v450_v58 = vld [vmem:[#allocation1 + $0x15f] sm:$0x4]   ;;  %v448_v61 = vsel %vm323_vm0, %v446_v57, %v444_v56  ;;  %v462_v62 = vld [vmem:[#allocation1 + $0x60] sm:$0x1]   ;;  %v997_v3 = vld [vmem:[%s1387_s0 + $0x36] sm:$0x3]  ;;  %v438_v7 = vsel %vm331_vm2, %v436_v60, %v434_v59 }
  0x17   :  { %367 = vrot.lane.b32.xlu0 %v366_v45, %s1057_s15  ;;  %v464_v63 = vld [vmem:[#allocation1 + $0xdf] sm:$0x2]   ;;  %v452_v4 = vsel %vm327_vm1, %v450_v58, %v448_v61  ;;  %v454_v5 = vld [vmem:[#allocation1 + $0x1de] sm:$0x8]   ;;  %188 = vst [vmem:[#allocation1 + $0xd8] sm:$0x3] %v997_v3 }
  0x18   :  { %v466_v1 = vsel %vm323_vm0, %v464_v63, %v462_v62  ;;  %v468_v2 = vld [vmem:[#allocation1 + $0x15e] sm:$0x4]   ;;  %v1013_v6 = vld [vmem:[%s1387_s0 + $0x16] sm:$0x3]  ;;  %s1059_s21 = smov 108   ;;  %v456_v13 = vsel %vm331_vm2, %v454_v5, %v452_v4  ;;  %s1060_s3 = smov 104  }
  0x19   :  { %403 = vrot.lane.b32.xlu1 %v402_v54, %s1058_s18  ;;  %v472_v8 = vld [vmem:[#allocation1 + $0x1dd] sm:$0x8]   ;;  %268 = vst [vmem:[#allocation1 + $0x58] sm:$0x3] %v1013_v6  ;;  %v470_v9 = vsel %vm327_vm1, %v468_v2, %v466_v1  ;;  %v966_v10 = vld [vmem:[%s1387_s0 + $0x74] sm:$0x3] }
  0x1a   :  { %v982_v11 = vld [vmem:[%s1387_s0 + $0x54] sm:$0x3]  ;;  %33 = vst [vmem:[#allocation1 + $0x1d0] sm:$0x3] %v966_v10  ;;  %v967_v15 = vld [vmem:[%s1387_s0 + $0x72] sm:$0x3]  ;;  %v474_v19 = vsel %vm331_vm2, %v472_v8, %v470_v9 }
  0x1b   :  { %421 = vrot.lane.b32.xlu0 %v420_v0, %s1059_s21  ;;  %v998_v12 = vld [vmem:[%s1387_s0 + $0x34] sm:$0x3]  ;;  %113 = vst [vmem:[#allocation1 + $0x150] sm:$0x3] %v982_v11  ;;  %38 = vst [vmem:[#allocation1 + $0x1c8] sm:$0x3] %v967_v15 }
  0x1c   :  { %193 = vst [vmem:[#allocation1 + $0xd0] sm:$0x3] %v998_v12  ;;  %v1014_v14 = vld [vmem:[%s1387_s0 + $0x14] sm:$0x3]  ;;  %v983_v16 = vld [vmem:[%s1387_s0 + $0x52] sm:$0x3] }
  0x1d   :  { %439 = vrot.lane.b32.xlu1 %v438_v7, %s1060_s3  ;;  %273 = vst [vmem:[#allocation1 + $0x50] sm:$0x3] %v1014_v14  ;;  %v999_v17 = vld [vmem:[%s1387_s0 + $0x32] sm:$0x3]  ;;  %v486_v20 = vld [vmem:[#allocation1 + $0x157] sm:$0x4]  }
  0x1e   :  { %v1015_v18 = vld [vmem:[%s1387_s0 + $0x12] sm:$0x3]  ;;  %v504_v21 = vld [vmem:[#allocation1 + $0x156] sm:$0x4]   ;;  %118 = vst [vmem:[#allocation1 + $0x148] sm:$0x3] %v983_v16 }
  0x1f   :  { %198 = vst [vmem:[#allocation1 + $0xc8] sm:$0x3] %v999_v17  ;;  %278 = vst [vmem:[#allocation1 + $0x48] sm:$0x3] %v1015_v18  ;;  %v968_v22 = vld [vmem:[%s1387_s0 + $0x70] sm:$0x3] }
  0x20   :  { %v984_v23 = vld [vmem:[%s1387_s0 + $0x50] sm:$0x3]  ;;  %s1061_s14 = smov 100   ;;  %v490_v24 = vld [vmem:[#allocation1 + $0x1d6] sm:$0x8]   ;;  %s1062_s21 = smov 96  }
  0x21   :  { %457 = vrot.lane.b32.xlu0 %v456_v13, %s1061_s14  ;;  %v508_v25 = vld [vmem:[#allocation1 + $0x1d5] sm:$0x8]   ;;  %43 = vst [vmem:[#allocation1 + $0x1c0] sm:$0x3] %v968_v22  ;;  %123 = vst [vmem:[#allocation1 + $0x140] sm:$0x3] %v984_v23  ;;  %475 = vrot.lane.b32.xlu1 %v474_v19, %s1062_s21 }
  0x22   :  { %v1000_v26 = vld [vmem:[%s1387_s0 + $0x30] sm:$0x3]  ;;  %v482_v28 = vld [vmem:[#allocation1 + $0xd8] sm:$0x2]   ;;  %v500_v29 = vld [vmem:[#allocation1 + $0xd7] sm:$0x2]  }
  0x23   :  { %v1016_v27 = vld [vmem:[%s1387_s0 + $0x10] sm:$0x3]  ;;  %203 = vst [vmem:[#allocation1 + $0xc0] sm:$0x3] %v1000_v26  ;;  %v969_v30 = vld [vmem:[%s1387_s0 + $0x6e] sm:$0x3] }
  0x24   :  { %283 = vst [vmem:[#allocation1 + $0x40] sm:$0x3] %v1016_v27  ;;  %v480_v31 = vld [vmem:[#allocation1 + $0x59] sm:$0x1]   ;;  %v498_v32 = vld [vmem:[#allocation1 + $0x58] sm:$0x1]  }
  0x25   :  { %48 = vst [vmem:[#allocation1 + $0x1b8] sm:$0x3] %v969_v30  ;;  %v985_v33 = vld [vmem:[%s1387_s0 + $0x4e] sm:$0x3]  ;;  %v484_v34 = vsel %vm323_vm0, %v482_v28, %v480_v31  ;;  %v502_v35 = vsel %vm323_vm0, %v500_v29, %v498_v32  ;;  %v518_v40 = vld [vmem:[#allocation1 + $0xd0] sm:$0x2]  }
  0x26   :  { %128 = vst [vmem:[#allocation1 + $0x138] sm:$0x3] %v985_v33  ;;  %v1001_v36 = vld [vmem:[%s1387_s0 + $0x2e] sm:$0x3]  ;;  %v488_v38 = vsel %vm327_vm1, %v486_v20, %v484_v34  ;;  %v506_v39 = vsel %vm327_vm1, %v504_v21, %v502_v35  ;;  %v522_v41 = vld [vmem:[#allocation1 + $0x14f] sm:$0x4]  }
  0x27   :  { %v1017_v37 = vld [vmem:[%s1387_s0 + $0xe] sm:$0x3]  ;;  %v526_v42 = vld [vmem:[#allocation1 + $0x1ce] sm:$0x8]   ;;  %208 = vst [vmem:[#allocation1 + $0xb8] sm:$0x3] %v1001_v36  ;;  %v492_v43 = vsel %vm331_vm2, %v490_v24, %v488_v38  ;;  %v510_v44 = vsel %vm331_vm2, %v508_v25, %v506_v39 }
  0x28   :  { %288 = vst [vmem:[#allocation1 + $0x38] sm:$0x3] %v1017_v37  ;;  %v516_v45 = vld [vmem:[#allocation1 + $0x51] sm:$0x1]   ;;  %v534_v46 = vld [vmem:[#allocation1 + $0x50] sm:$0x1]  }
  0x29   :  { %v536_v47 = vld [vmem:[#allocation1 + $0xcf] sm:$0x2]   ;;  %s1063_s28 = smov 92   ;;  %s1064_s29 = smov 88   ;;  %v520_v48 = vsel %vm323_vm0, %v518_v40, %v516_v45  ;;  %v552_v52 = vld [vmem:[#allocation1 + $0x49] sm:$0x1]  }
  0x2a   :  { %493 = vrot.lane.b32.xlu0 %v492_v43, %s1063_s28  ;;  %511 = vrot.lane.b32.xlu1 %v510_v44, %s1064_s29  ;;  %v538_v49 = vsel %vm323_vm0, %v536_v47, %v534_v46  ;;  %v540_v50 = vld [vmem:[#allocation1 + $0x14e] sm:$0x4]   ;;  %v524_v53 = vsel %vm327_vm1, %v522_v41, %v520_v48  ;;  %v554_v55 = vld [vmem:[#allocation1 + $0xc8] sm:$0x2]   ;;  %v570_v61 = vld [vmem:[#allocation1 + $0x48] sm:$0x1]  }
  0x2b   :  { %v544_v51 = vld [vmem:[#allocation1 + $0x1cd] sm:$0x8]   ;;  %v542_v54 = vsel %vm327_vm1, %v540_v50, %v538_v49  ;;  %v558_v56 = vld [vmem:[#allocation1 + $0x147] sm:$0x4]   ;;  %v528_v58 = vsel %vm331_vm2, %v526_v42, %v524_v53  ;;  %v556_v60 = vsel %vm323_vm0, %v554_v55, %v552_v52  ;;  %v572_v62 = vld [vmem:[#allocation1 + $0xc7] sm:$0x2]  }
  0x2c   :  { %v562_v57 = vld [vmem:[#allocation1 + $0x1c6] sm:$0x8]   ;;  %v546_v59 = vsel %vm331_vm2, %v544_v51, %v542_v54  ;;  %v576_v63 = vld [vmem:[#allocation1 + $0x146] sm:$0x4]   ;;  %v560_v0 = vsel %vm327_vm1, %v558_v56, %v556_v60  ;;  %v574_v1 = vsel %vm323_vm0, %v572_v62, %v570_v61  ;;  %v588_v3 = vld [vmem:[#allocation1 + $0x41] sm:$0x1]  }
  0x2d   :  { %v580_v2 = vld [vmem:[#allocation1 + $0x1c5] sm:$0x8]   ;;  %v590_v4 = vld [vmem:[#allocation1 + $0xc0] sm:$0x2]   ;;  %s1065_s30 = smov 84   ;;  %s1066_s2 = smov 80   ;;  %v578_v5 = vsel %vm327_vm1, %v576_v63, %v574_v1  ;;  %v564_v9 = vsel %vm331_vm2, %v562_v57, %v560_v0 }
  0x2e   :  { %529 = vrot.lane.b32.xlu0 %v528_v58, %s1065_s30  ;;  %547 = vrot.lane.b32.xlu1 %v546_v59, %s1066_s2  ;;  %v592_v6 = vsel %vm323_vm0, %v590_v4, %v588_v3  ;;  %v594_v7 = vld [vmem:[#allocation1 + $0x13f] sm:$0x4]   ;;  %v606_v8 = vld [vmem:[#allocation1 + $0x40] sm:$0x1]   ;;  %v582_v10 = vsel %vm331_vm2, %v580_v2, %v578_v5  ;;  %v626_v18 = vld [vmem:[#allocation1 + $0xb8] sm:$0x2]  }
  0x2f   :  { %v598_v11 = vld [vmem:[#allocation1 + $0x1be] sm:$0x8]   ;;  %v608_v12 = vld [vmem:[#allocation1 + $0xbf] sm:$0x2]   ;;  %v596_v14 = vsel %vm327_vm1, %v594_v7, %v592_v6  ;;  %v624_v17 = vld [vmem:[#allocation1 + $0x39] sm:$0x1]  }
  0x30   :  { %v612_v13 = vld [vmem:[#allocation1 + $0x13e] sm:$0x4]   ;;  %v610_v15 = vsel %vm323_vm0, %v608_v12, %v606_v8  ;;  %v628_v20 = vsel %vm323_vm0, %v626_v18, %v624_v17  ;;  %v630_v21 = vld [vmem:[#allocation1 + $0x137] sm:$0x4]   ;;  %v642_v22 = vld [vmem:[#allocation1 + $0x38] sm:$0x1]   ;;  %v600_v28 = vsel %vm331_vm2, %v598_v11, %v596_v14 }
  0x31   :  { %v616_v16 = vld [vmem:[#allocation1 + $0x1bd] sm:$0x8]   ;;  %v614_v19 = vsel %vm327_vm1, %v612_v13, %v610_v15  ;;  %v644_v23 = vld [vmem:[#allocation1 + $0xb7] sm:$0x2]   ;;  %s1067_s3 = smov 76   ;;  %s1068_s4 = smov 72   ;;  %v632_v33 = vsel %vm327_vm1, %v630_v21, %v628_v20 }
  0x32   :  { %565 = vrot.lane.b32.xlu0 %v564_v9, %s1067_s3  ;;  %583 = vrot.lane.b32.xlu1 %v582_v10, %s1068_s4  ;;  %v634_v24 = vld [vmem:[#allocation1 + $0x1b6] sm:$0x8]   ;;  %v646_v25 = vsel %vm323_vm0, %v644_v23, %v642_v22  ;;  %v648_v26 = vld [vmem:[#allocation1 + $0x136] sm:$0x4]   ;;  %v970_v27 = vld [vmem:[%s1387_s0 + $0x6c] sm:$0x3]  ;;  %v618_v29 = vsel %vm331_vm2, %v616_v16, %v614_v19 }
  0x33   :  { %53 = vst [vmem:[#allocation1 + $0x1b0] sm:$0x3] %v970_v27  ;;  %v986_v30 = vld [vmem:[%s1387_s0 + $0x4c] sm:$0x3]  ;;  %v650_v34 = vsel %vm327_vm1, %v648_v26, %v646_v25  ;;  %v652_v35 = vld [vmem:[#allocation1 + $0x1b5] sm:$0x8]   ;;  %v636_v42 = vsel %vm331_vm2, %v634_v24, %v632_v33 }
  0x34   :  { %v1002_v31 = vld [vmem:[%s1387_s0 + $0x2c] sm:$0x3]  ;;  %133 = vst [vmem:[#allocation1 + $0x130] sm:$0x3] %v986_v30  ;;  %v971_v36 = vld [vmem:[%s1387_s0 + $0x6a] sm:$0x3]  ;;  %v654_v43 = vsel %vm331_vm2, %v652_v35, %v650_v34 }
  0x35   :  { %v1018_v32 = vld [vmem:[%s1387_s0 + $0xc] sm:$0x3]  ;;  %213 = vst [vmem:[#allocation1 + $0xb0] sm:$0x3] %v1002_v31  ;;  %v987_v37 = vld [vmem:[%s1387_s0 + $0x4a] sm:$0x3] }
  0x36   :  { %293 = vst [vmem:[#allocation1 + $0x30] sm:$0x3] %v1018_v32  ;;  %58 = vst [vmem:[#allocation1 + $0x1a8] sm:$0x3] %v971_v36  ;;  %v1003_v38 = vld [vmem:[%s1387_s0 + $0x2a] sm:$0x3] }
  0x37   :  { %138 = vst [vmem:[#allocation1 + $0x128] sm:$0x3] %v987_v37  ;;  %v1019_v39 = vld [vmem:[%s1387_s0 + $0xa] sm:$0x3]  ;;  %s1069_s21 = smov 68   ;;  %s1070_s22 = smov 64  }
  0x38   :  { %601 = vrot.lane.b32.xlu0 %v600_v28, %s1069_s21  ;;  %619 = vrot.lane.b32.xlu1 %v618_v29, %s1070_s22  ;;  %218 = vst [vmem:[#allocation1 + $0xa8] sm:$0x3] %v1003_v38  ;;  %298 = vst [vmem:[#allocation1 + $0x28] sm:$0x3] %v1019_v39  ;;  %v972_v40 = vld [vmem:[%s1387_s0 + $0x68] sm:$0x3] }
  0x39   :  { %v988_v41 = vld [vmem:[%s1387_s0 + $0x48] sm:$0x3]  ;;  %63 = vst [vmem:[#allocation1 + $0x1a0] sm:$0x3] %v972_v40  ;;  %v973_v46 = vld [vmem:[%s1387_s0 + $0x66] sm:$0x3] }
  0x3a   :  { %143 = vst [vmem:[#allocation1 + $0x120] sm:$0x3] %v988_v41  ;;  %v1004_v44 = vld [vmem:[%s1387_s0 + $0x28] sm:$0x3]  ;;  %68 = vst [vmem:[#allocation1 + $0x198] sm:$0x3] %v973_v46 }
  0x3b   :  { %v1020_v45 = vld [vmem:[%s1387_s0 + $0x8] sm:$0x3]  ;;  %223 = vst [vmem:[#allocation1 + $0xa0] sm:$0x3] %v1004_v44  ;;  %v989_v47 = vld [vmem:[%s1387_s0 + $0x46] sm:$0x3] }
  0x3c   :  { %303 = vst [vmem:[#allocation1 + $0x20] sm:$0x3] %v1020_v45  ;;  %v1005_v48 = vld [vmem:[%s1387_s0 + $0x26] sm:$0x3]  ;;  %148 = vst [vmem:[#allocation1 + $0x118] sm:$0x3] %v989_v47 }
  0x3d   :  { %v1021_v49 = vld [vmem:[%s1387_s0 + $0x6] sm:$0x3]  ;;  %228 = vst [vmem:[#allocation1 + $0x98] sm:$0x3] %v1005_v48  ;;  %v974_v50 = vld [vmem:[%s1387_s0 + $0x64] sm:$0x3] }
  0x3e   :  { %308 = vst [vmem:[#allocation1 + $0x18] sm:$0x3] %v1021_v49  ;;  %v990_v51 = vld [vmem:[%s1387_s0 + $0x44] sm:$0x3]  ;;  %s1071_s14 = smov 60   ;;  %s1072_s15 = smov 56  }
  0x3f   :  { %637 = vrot.lane.b32.xlu0 %v636_v42, %s1071_s14  ;;  %655 = vrot.lane.b32.xlu1 %v654_v43, %s1072_s15  ;;  %v670_v52 = vld [vmem:[#allocation1 + $0x1ae] sm:$0x8]   ;;  %v688_v53 = vld [vmem:[#allocation1 + $0x1ad] sm:$0x8]   ;;  %73 = vst [vmem:[#allocation1 + $0x190] sm:$0x3] %v974_v50 }
  0x40   :  { %153 = vst [vmem:[#allocation1 + $0x110] sm:$0x3] %v990_v51  ;;  %v1006_v54 = vld [vmem:[%s1387_s0 + $0x24] sm:$0x3]  ;;  %v660_v55 = vld [vmem:[#allocation1 + $0x31] sm:$0x1]  }
  0x41   :  { %v662_v56 = vld [vmem:[#allocation1 + $0xb0] sm:$0x2]   ;;  %233 = vst [vmem:[#allocation1 + $0x90] sm:$0x3] %v1006_v54  ;;  %v678_v59 = vld [vmem:[#allocation1 + $0x30] sm:$0x1]  }
  0x42   :  { %v666_v57 = vld [vmem:[#allocation1 + $0x12f] sm:$0x4]   ;;  %v664_v58 = vsel %vm323_vm0, %v662_v56, %v660_v55  ;;  %v680_v60 = vld [vmem:[#allocation1 + $0xaf] sm:$0x2]   ;;  %v696_v0 = vld [vmem:[#allocation1 + $0x29] sm:$0x1]  }
  0x43   :  { %v684_v61 = vld [vmem:[#allocation1 + $0x12e] sm:$0x4]   ;;  %v668_v62 = vsel %vm327_vm1, %v666_v57, %v664_v58  ;;  %v682_v63 = vsel %vm323_vm0, %v680_v60, %v678_v59  ;;  %v698_v1 = vld [vmem:[#allocation1 + $0xa8] sm:$0x2]   ;;  %v714_v7 = vld [vmem:[#allocation1 + $0x28] sm:$0x1]  }
  0x44   :  { %v702_v2 = vld [vmem:[#allocation1 + $0x127] sm:$0x4]   ;;  %v672_v3 = vsel %vm331_vm2, %v670_v52, %v668_v62  ;;  %v686_v4 = vsel %vm327_vm1, %v684_v61, %v682_v63  ;;  %v700_v5 = vsel %vm323_vm0, %v698_v1, %v696_v0  ;;  %v716_v8 = vld [vmem:[#allocation1 + $0xa7] sm:$0x2]   ;;  %s1073_s18 = smov 52   ;;  %s1074_s19 = smov 48  }
  0x45   :  { %v706_v6 = vld [vmem:[#allocation1 + $0x1a6] sm:$0x8]   ;;  %673 = vrot.lane.b32.xlu0 %v672_v3, %s1073_s18  ;;  %v690_v9 = vsel %vm331_vm2, %v688_v53, %v686_v4  ;;  %v704_v10 = vsel %vm327_vm1, %v702_v2, %v700_v5  ;;  %v718_v11 = vsel %vm323_vm0, %v716_v8, %v714_v7  ;;  %v720_v12 = vld [vmem:[#allocation1 + $0x126] sm:$0x4]   ;;  %v732_v14 = vld [vmem:[#allocation1 + $0x21] sm:$0x1]  }
  0x46   :  { %v724_v13 = vld [vmem:[#allocation1 + $0x1a5] sm:$0x8]   ;;  %691 = vrot.lane.b32.xlu1 %v690_v9, %s1074_s19  ;;  %v708_v15 = vsel %vm331_vm2, %v706_v6, %v704_v10  ;;  %v722_v16 = vsel %vm327_vm1, %v720_v12, %v718_v11  ;;  %v734_v17 = vld [vmem:[#allocation1 + $0xa0] sm:$0x2]   ;;  %v750_v22 = vld [vmem:[#allocation1 + $0x20] sm:$0x1]  }
  0x47   :  { %v738_v18 = vld [vmem:[#allocation1 + $0x11f] sm:$0x4]   ;;  %v726_v20 = vsel %vm331_vm2, %v724_v13, %v722_v16  ;;  %v736_v21 = vsel %vm323_vm0, %v734_v17, %v732_v14  ;;  %v752_v23 = vld [vmem:[#allocation1 + $0x9f] sm:$0x2]   ;;  %v768_v28 = vld [vmem:[#allocation1 + $0x19] sm:$0x1]  }
  0x48   :  { %v742_v19 = vld [vmem:[#allocation1 + $0x19e] sm:$0x8]   ;;  %v756_v24 = vld [vmem:[#allocation1 + $0x11e] sm:$0x4]   ;;  %v740_v25 = vsel %vm327_vm1, %v738_v18, %v736_v21  ;;  %v754_v26 = vsel %vm323_vm0, %v752_v23, %v750_v22  ;;  %v770_v29 = vld [vmem:[#allocation1 + $0x98] sm:$0x2]  }
  0x49   :  { %v760_v27 = vld [vmem:[#allocation1 + $0x19d] sm:$0x8]   ;;  %s1075_s20 = smov 44   ;;  %v758_v30 = vsel %vm327_vm1, %v756_v24, %v754_v26  ;;  %v772_v31 = vsel %vm323_vm0, %v770_v29, %v768_v28  ;;  %v774_v32 = vld [vmem:[#allocation1 + $0x117] sm:$0x4]   ;;  %s1076_s21 = smov 40   ;;  %v744_v34 = vsel %vm331_vm2, %v742_v19, %v740_v25 }
  0x4a   :  { %709 = vrot.lane.b32.xlu0 %v708_v15, %s1075_s20  ;;  %v786_v33 = vld [vmem:[#allocation1 + $0x18] sm:$0x1]   ;;  %727 = vrot.lane.b32.xlu1 %v726_v20, %s1076_s21  ;;  %v762_v37 = vsel %vm331_vm2, %v760_v27, %v758_v30  ;;  %v776_v38 = vsel %vm327_vm1, %v774_v32, %v772_v31  ;;  %v778_v39 = vld [vmem:[#allocation1 + $0x196] sm:$0x8]   ;;  %v1022_v41 = vld [vmem:[%s1387_s0 + $0x4] sm:$0x3] }
  0x4b   :  { %v788_v35 = vld [vmem:[#allocation1 + $0x97] sm:$0x2]   ;;  %313 = vst [vmem:[#allocation1 + $0x10] sm:$0x3] %v1022_v41  ;;  %s1077_s24 = smov 36   ;;  %s1078_s27 = smov 32   ;;  %v780_v45 = vsel %vm331_vm2, %v778_v39, %v776_v38 }
  0x4c   :  { %v792_v36 = vld [vmem:[#allocation1 + $0x116] sm:$0x4]   ;;  %v790_v40 = vsel %vm323_vm0, %v788_v35, %v786_v33  ;;  %v975_v44 = vld [vmem:[%s1387_s0 + $0x62] sm:$0x3]  ;;  %v806_v54 = vld [vmem:[#allocation1 + $0x90] sm:$0x2]  }
  0x4d   :  { %v794_v42 = vsel %vm327_vm1, %v792_v36, %v790_v40  ;;  %v796_v43 = vld [vmem:[#allocation1 + $0x195] sm:$0x8]   ;;  %78 = vst [vmem:[#allocation1 + $0x188] sm:$0x3] %v975_v44  ;;  %v991_v46 = vld [vmem:[%s1387_s0 + $0x42] sm:$0x3] }
  0x4e   :  { %745 = vrot.lane.b32.xlu0 %v744_v34, %s1077_s24  ;;  %763 = vrot.lane.b32.xlu1 %v762_v37, %s1078_s27  ;;  %v1007_v47 = vld [vmem:[%s1387_s0 + $0x22] sm:$0x3]  ;;  %v798_v49 = vsel %vm331_vm2, %v796_v43, %v794_v42  ;;  %158 = vst [vmem:[#allocation1 + $0x108] sm:$0x3] %v991_v46  ;;  %v976_v50 = vld [vmem:[%s1387_s0 + $0x60] sm:$0x3] }
  0x4f   :  { %v1023_v48 = vld [vmem:[%s1387_s0 + $0x2] sm:$0x3]  ;;  %238 = vst [vmem:[#allocation1 + $0x88] sm:$0x3] %v1007_v47  ;;  %v992_v51 = vld [vmem:[%s1387_s0 + $0x40] sm:$0x3] }
  0x50   :  { %317 = vst [vmem:[#allocation1 + $0x8] sm:$0x3] %v1023_v48  ;;  %83 = vst [vmem:[#allocation1 + $0x180] sm:$0x3] %v976_v50  ;;  %v1008_v52 = vld [vmem:[%s1387_s0 + $0x20] sm:$0x3] }
  0x51   :  { %163 = vst [vmem:[#allocation1 + $0x100] sm:$0x3] %v992_v51  ;;  %v318_v53 = vld [vmem:[%s1387_s0] sm:$0x3]  ;;  %s1079_s0 = smov 28   ;;  %s1080_s13 = smov 24  }
  0x52   :  { %781 = vrot.lane.b32.xlu0 %v780_v45, %s1079_s0  ;;  %v824_v55 = vld [vmem:[#allocation1 + $0x8f] sm:$0x2]   ;;  %243 = vst [vmem:[#allocation1 + $0x80] sm:$0x3] %v1008_v52  ;;  %319 = vst [vmem:[#allocation1] sm:$0x3] %v318_v53  ;;  %799 = vrot.lane.b32.xlu1 %v798_v49, %s1080_s13 }
  0x53   :  { %v810_v56 = vld [vmem:[#allocation1 + $0x10f] sm:$0x4]   ;;  %v828_v58 = vld [vmem:[#allocation1 + $0x10e] sm:$0x4]   ;;  %s1081_s14 = smov 20   ;;  %s1082_s15 = smov 16  }
  0x54   :  { %v814_v57 = vld [vmem:[#allocation1 + $0x18e] sm:$0x8]   ;;  %v822_v60 = vld [vmem:[#allocation1 + $0x10] sm:$0x1]   ;;  %v850_v2 = vld [vmem:[#allocation1 + $0x186] sm:$0x8]  }
  0x55   :  { %v804_v59 = vld [vmem:[#allocation1 + $0x11] sm:$0x1]   ;;  %v832_v61 = vld [vmem:[#allocation1 + $0x18d] sm:$0x8]   ;;  %v826_v63 = vsel %vm323_vm0, %v824_v55, %v822_v60  ;;  %v868_v3 = vld [vmem:[#allocation1 + $0x185] sm:$0x8]  }
  0x56   :  { %v808_v62 = vsel %vm323_vm0, %v806_v54, %v804_v59  ;;  %v830_v1 = vsel %vm327_vm1, %v828_v58, %v826_v63  ;;  %v842_v7 = vld [vmem:[#allocation1 + $0x88] sm:$0x2]   ;;  %v860_v11 = vld [vmem:[#allocation1 + $0x87] sm:$0x2]   ;;  %s1083_s16 = smov 12   ;;  %s1084_s17 = smov 8  }
  0x57   :  { %v812_v0 = vsel %vm327_vm1, %v810_v56, %v808_v62  ;;  %v834_v5 = vsel %vm331_vm2, %v832_v61, %v830_v1  ;;  %v840_v6 = vld [vmem:[#allocation1 + $0x9] sm:$0x1]   ;;  %v858_v10 = vld [vmem:[#allocation1 + $0x8] sm:$0x1]   ;;  %v886_v21 = vld [vmem:[#allocation1 + $0x17e] sm:$0x8]  }
  0x58   :  { %v816_v4 = vsel %vm331_vm2, %v814_v57, %v812_v0  ;;  %v846_v8 = vld [vmem:[#allocation1 + $0x107] sm:$0x4]   ;;  %835 = vrot.lane.b32.xlu1 %v834_v5, %s1082_s15  ;;  %v844_v9 = vsel %vm323_vm0, %v842_v7, %v840_v6  ;;  %v864_v12 = vld [vmem:[#allocation1 + $0x106] sm:$0x4]   ;;  %v862_v14 = vsel %vm323_vm0, %v860_v11, %v858_v10  ;;  %v882_v17 = vld [vmem:[#allocation1 + $0xff] sm:$0x4]  }
  0x59   :  { %817 = vrot.lane.b32.xlu0 %v816_v4, %s1081_s14  ;;  %v848_v13 = vsel %vm327_vm1, %v846_v8, %v844_v9  ;;  %v876_v15 = vld [vmem:[#allocation1 + $0x1] sm:$0x1]   ;;  %v866_v19 = vsel %vm327_vm1, %v864_v12, %v862_v14  ;;  %v320_v22 = vld [vmem:[#allocation1] sm:$0x1]   ;;  %s1085_s18 = smov 4   ;;  %vm351_vm4 = vcmask 1048544  }
  0x5a   :  { %v878_v16 = vld [vmem:[#allocation1 + $0x80] sm:$0x2]   ;;  %v852_v18 = vsel %vm331_vm2, %v850_v2, %v848_v13  ;;  %v322_v23 = vld [vmem:[#allocation1 + $0x7f] sm:$0x2]   ;;  %v870_v24 = vsel %vm331_vm2, %v868_v3, %v866_v19  ;;  %vm369_vm5 = vcmask 1015744   ;;  %vm387_vm6 = vcmask 982944  }
  0x5b   :  { %v880_v20 = vsel %vm323_vm0, %v878_v16, %v876_v15  ;;  %v324_v26 = vsel %vm323_vm0, %v322_v23, %v320_v22  ;;  %v326_v27 = vld [vmem:[#allocation1 + $0xfe] sm:$0x4]   ;;  %vm405_vm7 = vcmask 950144   ;;  %vm423_vm8 = vcmask 917344  }
  0x5c   :  { %v884_v25 = vsel %vm327_vm1, %v882_v17, %v880_v20  ;;  %v330_v28 = vld [vmem:[#allocation1 + $0x17d] sm:$0x8]   ;;  %871 = vrot.lane.b32.xlu1 %v870_v24, %s1084_s17  ;;  %v328_v30 = vsel %vm327_vm1, %v326_v27, %v324_v26  ;;  %vm441_vm9 = vcmask 884544   ;;  %vm459_vm10 = vcmask 851744  }
  0x5d   :  { %853 = vrot.lane.b32.xlu0 %v852_v18, %s1083_s16  ;;  %v888_v29 = vsel %vm331_vm2, %v886_v21, %v884_v25  ;;  %v332_v31 = vsel %vm331_vm2, %v330_v28, %v328_v30  ;;  %vm477_vm11 = vcmask 818944   ;;  %vm495_vm12 = vcmask 786144  }
  0x5e   :  { %334 = vst.msk [vmem:[#allocation0] sm:$0xf] %vm333_vm3, %v332_v31   ;;  %vm513_vm13 = vcmask 753344   ;;  %vm531_vm14 = vcmask 720544   ;;  %vm549_vm15 = vcmask 687744   ;;  %vm567_vm0 = vcmask 654944  }
  0x5f   :  { %vm585_vm1 = vcmask 622144   ;;  %vm603_vm2 = vcmask 589344   ;;  %vm621_vm3 = vcmask 556544  }
  0x61   :  { %889 = vrot.lane.b32.xlu0 %v888_v29, %s1085_s18 }
  0x85   :  { %v350_v32 = vpop.permute.xlu0 %349  }
  0x86   :  { %352 = vst.msk [vmem:[#allocation0] sm:$0xf] %vm351_vm4, %v350_v32   ;;  %vm639_vm4 = vcmask 523744  }
  0x87   :  { %v386_v33 = vpop.permute.xlu1 %385  }
  0x89   :  { %v368_v34 = vpop.permute.xlu0 %367  }
  0x8a   :  { %370 = vst.msk [vmem:[#allocation0] sm:$0xf] %vm369_vm5, %v368_v34   ;;  %vm657_vm5 = vcmask 490944  }
  0x8b   :  { %388 = vst.msk [vmem:[#allocation0] sm:$0xf] %vm387_vm6, %v386_v33   ;;  %v404_v35 = vpop.permute.xlu1 %403   ;;  %vm675_vm6 = vcmask 458144  }
  0x8c   :  { %406 = vst.msk [vmem:[#allocation0] sm:$0xf] %vm405_vm7, %v404_v35   ;;  %vm693_vm7 = vcmask 425344  }
  0x8d   :  { %v422_v36 = vpop.permute.xlu0 %421  }
  0x8e   :  { %424 = vst.msk [vmem:[#allocation0] sm:$0xf] %vm423_vm8, %v422_v36   ;;  %vm711_vm8 = vcmask 392544  }
  0x8f   :  { %v440_v37 = vpop.permute.xlu1 %439  }
  0x90   :  { %442 = vst.msk [vmem:[#allocation0] sm:$0xf] %vm441_vm9, %v440_v37   ;;  %vm729_vm9 = vcmask 359744  }
  0x93   :  { %v458_v38 = vpop.permute.xlu0 %457   ;;  %v476_v39 = vpop.permute.xlu1 %475  }
  0x94   :  { %460 = vst.msk [vmem:[#allocation0] sm:$0xf] %vm459_vm10, %v458_v38   ;;  %vm747_vm10 = vcmask 326944  }
  0x95   :  { %478 = vst.msk [vmem:[#allocation0] sm:$0xf] %vm477_vm11, %v476_v39   ;;  %vm765_vm11 = vcmask 294144  }
  0x9c   :  { %v494_v40 = vpop.permute.xlu0 %493   ;;  %v512_v41 = vpop.permute.xlu1 %511  }
  0x9d   :  { %496 = vst.msk [vmem:[#allocation0] sm:$0xf] %vm495_vm12, %v494_v40   ;;  %vm783_vm12 = vcmask 261344  }
  0x9e   :  { %514 = vst.msk [vmem:[#allocation0] sm:$0xf] %vm513_vm13, %v512_v41   ;;  %vm801_vm13 = vcmask 228544  }
  0xa0   :  { %v530_v42 = vpop.permute.xlu0 %529   ;;  %v548_v43 = vpop.permute.xlu1 %547  }
  0xa1   :  { %532 = vst.msk [vmem:[#allocation0] sm:$0xf] %vm531_vm14, %v530_v42   ;;  %vm819_vm14 = vcmask 195744  }
  0xa2   :  { %550 = vst.msk [vmem:[#allocation0] sm:$0xf] %vm549_vm15, %v548_v43   ;;  %vm837_vm15 = vcmask 162944  }
  0xa4   :  { %v566_v44 = vpop.permute.xlu0 %565   ;;  %v584_v45 = vpop.permute.xlu1 %583  }
  0xa5   :  { %568 = vst.msk [vmem:[#allocation0] sm:$0xf] %vm567_vm0, %v566_v44   ;;  %vm855_vm0 = vcmask 130144  }
  0xa6   :  { %586 = vst.msk [vmem:[#allocation0] sm:$0xf] %vm585_vm1, %v584_v45   ;;  %vm873_vm1 = vcmask 97344  }
  0xaa   :  { %v602_v46 = vpop.permute.xlu0 %601   ;;  %v620_v47 = vpop.permute.xlu1 %619  }
  0xab   :  { %604 = vst.msk [vmem:[#allocation0] sm:$0xf] %vm603_vm2, %v602_v46   ;;  %vm891_vm2 = vcmask 64544  }
  0xac   :  { %622 = vst.msk [vmem:[#allocation0] sm:$0xf] %vm621_vm3, %v620_v47  }
  0xb1   :  { %v638_v48 = vpop.permute.xlu0 %637   ;;  %v656_v49 = vpop.permute.xlu1 %655  }
  0xb2   :  { %640 = vst.msk [vmem:[#allocation0] sm:$0xf] %vm639_vm4, %v638_v48  }
  0xb3   :  { %658 = vst.msk [vmem:[#allocation0] sm:$0xf] %vm657_vm5, %v656_v49  }
  0xb7   :  { %v674_v50 = vpop.permute.xlu0 %673  }
  0xb8   :  { %676 = vst.msk [vmem:[#allocation0] sm:$0xf] %vm675_vm6, %v674_v50   ;;  %v692_v51 = vpop.permute.xlu1 %691  }
  0xb9   :  { %694 = vst.msk [vmem:[#allocation0] sm:$0xf] %vm693_vm7, %v692_v51  }
  0xbc   :  { %v710_v52 = vpop.permute.xlu0 %709   ;;  %v728_v53 = vpop.permute.xlu1 %727  }
  0xbd   :  { %712 = vst.msk [vmem:[#allocation0] sm:$0xf] %vm711_vm8, %v710_v52  }
  0xbe   :  { %730 = vst.msk [vmem:[#allocation0] sm:$0xf] %vm729_vm9, %v728_v53  }
  0xc0   :  { %v746_v54 = vpop.permute.xlu0 %745   ;;  %v764_v55 = vpop.permute.xlu1 %763  }
  0xc1   :  { %748 = vst.msk [vmem:[#allocation0] sm:$0xf] %vm747_vm10, %v746_v54  }
  0xc2   :  { %766 = vst.msk [vmem:[#allocation0] sm:$0xf] %vm765_vm11, %v764_v55  }
  0xc4   :  { %v782_v56 = vpop.permute.xlu0 %781   ;;  %v800_v57 = vpop.permute.xlu1 %799  }
  0xc5   :  { %784 = vst.msk [vmem:[#allocation0] sm:$0xf] %vm783_vm12, %v782_v56  }
  0xc6   :  { %802 = vst.msk [vmem:[#allocation0] sm:$0xf] %vm801_vm13, %v800_v57  }
  0xca   :  { %v836_v59 = vpop.permute.xlu1 %835  }
  0xcb   :  { %v818_v58 = vpop.permute.xlu0 %817  }
  0xcc   :  { %820 = vst.msk [vmem:[#allocation0] sm:$0xf] %vm819_vm14, %v818_v58  }
  0xcd   :  { %838 = vst.msk [vmem:[#allocation0] sm:$0xf] %vm837_vm15, %v836_v59  }
  0xce   :  { %v872_v61 = vpop.permute.xlu1 %871  }
  0xcf   :  { %v854_v60 = vpop.permute.xlu0 %853  }
  0xd0   :  { %856 = vst.msk [vmem:[#allocation0] sm:$0xf] %vm855_vm0, %v854_v60  }
  0xd1   :  { %874 = vst.msk [vmem:[#allocation0] sm:$0xf] %vm873_vm1, %v872_v61  }
  0xd3   :  { %v890_v62 = vpop.permute.xlu0 %889  }
  0xd4   :  { %892 = vst.msk [vmem:[#allocation0] sm:$0xf] %vm891_vm2, %v890_v62  }
  0xdb   :  { %v896_v63 = vld [vmem:[#allocation0] sm:$0xf] }
  0xdc   :  { %898 = vst [vmem:[%s1388_s1] sm:$0xf] %v896_v63 }

// kernel: fwd.21
= control target key start
LH: loop header
LB: loop body
LE: loop exit
PB: predicated region body
PF: predicated region fallthrough
CT: control target
= control target key end

     0   :  { %vm27_vm0 = vcmask 1043456   ;;  %v91_v0 = vmov 0.0   ;;  %vm92_vm1 = vmmov 0   ;;  %v93_v4 = vmov 0   ;;  %s126_s1 = inlined_call_operand.vmem [shape: bf16[8,80], index: 1, kind: input, shape index: {}]   ;;  %s127_s0 = inlined_call_operand.vmem [shape: bf16[8,8], index: 0, kind: input, shape index: {}]   ;;  %s128_s2 = inlined_call_operand.vmem [shape: f32[8,1], index: 2, kind: input, shape index: {}]   ;;  %s129_s3 = inlined_call_operand.vmem [shape: f32[8,80], index: 3, kind: output, shape index: {}]  }
   0x1   :  { %81 = vmatprep.subr.bf16.mxu0 %v91_v0  ;;  %v15_v1 = vld [vmem:[%s126_s1] sm:$0xf]  ;;  %83 = vmatprep.mubr.msk.bf16.mxu0 %vm92_vm1, %v91_v0  ;;  %vm23_vm2 = vcmask 64512   ;;  %vm72_vm3 = vcmask 654336  }
   0x2   :  { %v17_v2 = vld [vmem:[%s128_s2] sm:$0xff]  ;;  %v29_v3 = vsel %vm27_vm0, %v15_v1, 0  ;;  %90 = vset.pattern.permute.xlu0 %v93_v4 }
   0x3   :  { %82 = vmatpush3.bf16.msra.mxu0 %v29_v3  ;;  %v16_v5 = vld [vmem:[%s127_s0] sm:$0xf]  ;;  %20 = vperm.xlu0 %90, %v17_v2  }
   0x6   :  { %84 = vmatmul.mubr.msk.bf16.vlgmr.msra.gmra.mrb[0].mxu0 %vm23_vm2, %v16_v5 }
  0x82   :  { %v21_v6 = vpop.permute.xlu0 %20 }
  0xd9   :  { %v65_v7 = vpop.f32.mrb[0].mxu0 }
  0xda   :  { %v66_v8 = vadd.f32 %v65_v7, %v21_v6  ;;  %v85_v9 = vpop.f32.mrb[1].mxu0 }
  0xdb   :  { %v68_v10 = vpop.f32.mrb[2].mxu0 }
  0xdc   :  { %v71_v11 = vmax.f32 %v66_v8, 0.0  ;;  %v86_v12 = vpop.f32.mrb[3].mxu0 }
  0xde   :  { %73 = vst.msk [vmem:[%s129_s3] sm:$0xff] %vm72_vm3, %v71_v11 }

// kernel: reverse.0
= control target key start
LH: loop header
LB: loop body
LE: loop exit
PB: predicated region body
PF: predicated region fallthrough
CT: control target
= control target key end

     0   :  { %v79_v8 = vld [vmem:[#allocation1 + $0x38] sm:$0xf]  ;;  %v89_v9 = vld [vmem:[#allocation1 + $0x30] sm:$0xf]  ;;  %v99_v10 = vld [vmem:[#allocation1 + $0x28] sm:$0xf]  ;;  %v156_v12 = vlaneseq  ;;  %s487_s0 = inlined_call_operand.vmem [shape: f32[4,2,8,3], index: 0, kind: input, shape index: {}]   ;;  %s488_s1 = inlined_call_operand.vmem [shape: f32[4,2,8,3], index: 1, kind: output, shape index: {}]  }
   0x1   :  { %v18_v0 = vld [vmem:[%s487_s0] sm:$0xf]  ;;  %v20_v1 = vld [vmem:[%s487_s0 + $0x4] sm:$0xf]  ;;  %v22_v2 = vld [vmem:[%s487_s0 + $0x8] sm:$0xf] }
   0x2   :  { %19 = vst [vmem:[#allocation1 + $0x4] sm:$0xf] %v18_v0  ;;  %21 = vst [vmem:[#allocation1 + $0xc] sm:$0xf] %v20_v1  ;;  %v24_v3 = vld [vmem:[%s487_s0 + $0xc] sm:$0xf] }
   0x3   :  { %23 = vst [vmem:[#allocation1 + $0x14] sm:$0xf] %v22_v2  ;;  %v26_v4 = vld [vmem:[%s487_s0 + $0x10] sm:$0xf]  ;;  %v28_v5 = vld [vmem:[%s487_s0 + $0x14] sm:$0xf] }
   0x4   :  { %25 = vst [vmem:[#allocation1 + $0x1c] sm:$0xf] %v24_v3  ;;  %27 = vst [vmem:[#allocation1 + $0x24] sm:$0xf] %v26_v4  ;;  %v30_v6 = vld [vmem:[%s487_s0 + $0x18] sm:$0xf] }
   0x5   :  { %29 = vst [vmem:[#allocation1 + $0x2c] sm:$0xf] %v28_v5  ;;  %v32_v7 = vld [vmem:[%s487_s0 + $0x1c] sm:$0xf]  ;;  %31 = vst [vmem:[#allocation1 + $0x34] sm:$0xf] %v30_v6 }
   0x6   :  { %33 = vst [vmem:[#allocation1 + $0x3c] sm:$0xf] %v32_v7  ;;  %81 = vst [vmem:[#allocation0 + $0x70] sm:$0xf] %v79_v8  ;;  %v109_v11 = vld [vmem:[#allocation1 + $0x20] sm:$0xf] }
   0x7   :  { %91 = vst [vmem:[#allocation0 + $0x60] sm:$0xf] %v89_v9  ;;  %101 = vst [vmem:[#allocation0 + $0x50] sm:$0xf] %v99_v10  ;;  %v119_v13 = vld [vmem:[#allocation1 + $0x18] sm:$0xf] }
   0x8   :  { %111 = vst [vmem:[#allocation0 + $0x40] sm:$0xf] %v109_v11  ;;  %v129_v14 = vld [vmem:[#allocation1 + $0x10] sm:$0xf]  ;;  %v139_v15 = vld [vmem:[#allocation1 + $0x8] sm:$0xf] }
   0x9   :  { %121 = vst [vmem:[#allocation0 + $0x30] sm:$0xf] %v119_v13  ;;  %131 = vst [vmem:[#allocation0 + $0x20] sm:$0xf] %v129_v14  ;;  %v146_v16 = vld [vmem:[#allocation1] sm:$0xf] }
   0xa   :  { %141 = vst [vmem:[#allocation0 + $0x10] sm:$0xf] %v139_v15  ;;  %147 = vst [vmem:[#allocation0] sm:$0xf] %v146_v16  ;;  %v456_v17 = vshrl.u32 %v156_v12, 7 }
   0xb   :  { %v124_v18 = vld [vmem:[#allocation1 + $0x14] sm:$0xf]  ;;  %v134_v19 = vld [vmem:[#allocation1 + $0xc] sm:$0xf]  ;;  %v143_v20 = vld [vmem:[#allocation1 + $0x4] sm:$0xf] }
   0xc   :  { %v94_v21 = vld [vmem:[#allocation1 + $0x2c] sm:$0xf]  ;;  %v104_v22 = vld [vmem:[#allocation1 + $0x24] sm:$0xf]  ;;  %v114_v23 = vld [vmem:[#allocation1 + $0x1c] sm:$0xf] }
   0xd   :  { %126 = vst [vmem:[#allocation0 + $0x28] sm:$0xf] %v124_v18  ;;  %136 = vst [vmem:[#allocation0 + $0x18] sm:$0xf] %v134_v19  ;;  %v74_v24 = vld [vmem:[#allocation1 + $0x3c] sm:$0xf] }
   0xe   :  { %145 = vst [vmem:[#allocation0 + $0x8] sm:$0xf] %v143_v20  ;;  %v84_v25 = vld [vmem:[#allocation1 + $0x34] sm:$0xf]  ;;  %96 = vst [vmem:[#allocation0 + $0x58] sm:$0xf] %v94_v21 }
   0xf   :  { %106 = vst [vmem:[#allocation0 + $0x48] sm:$0xf] %v104_v22  ;;  %116 = vst [vmem:[#allocation0 + $0x38] sm:$0xf] %v114_v23  ;;  %v247_v26 = vld [vmem:[#allocation0 + $0x77] ss:$-1 sm:$0xff] }
  0x10   :  { %76 = vst [vmem:[#allocation0 + $0x78] sm:$0xf] %v74_v24  ;;  %86 = vst [vmem:[#allocation0 + $0x68] sm:$0xf] %v84_v25  ;;  %v205_v27 = vld [vmem:[#allocation0 + $0x47] ss:$-1 sm:$0xff] }
  0x11   :  { %v219_v28 = vld [vmem:[#allocation0 + $0x57] ss:$-1 sm:$0xff]  ;;  %v233_v29 = vld [vmem:[#allocation0 + $0x67] ss:$-1 sm:$0xff]  ;;  %v206_v37 = vrot.slane %v205_v27, 5  ;;  %v248_v41 = vrot.slane %v247_v26, 5 }
  0x12   :  { %v163_v30 = vld [vmem:[#allocation0 + $0x17] ss:$-1 sm:$0xff]  ;;  %v177_v31 = vld [vmem:[#allocation0 + $0x27] ss:$-1 sm:$0xff]  ;;  %v220_v39 = vrot.slane %v219_v28, 5  ;;  %v234_v40 = vrot.slane %v233_v29, 5 }
  0x13   :  { %v191_v32 = vld [vmem:[#allocation0 + $0x37] ss:$-1 sm:$0xff]  ;;  %v149_v33 = vld [vmem:[#allocation0 + $0x7] ss:$-1 sm:$0xff]  ;;  %v164_v34 = vrot.slane %v163_v30, 5  ;;  %v178_v35 = vrot.slane %v177_v31, 5 }
  0x14   :  { %v192_v36 = vrot.slane %v191_v32, 5  ;;  %v150_v38 = vrot.slane %v149_v33, 5  ;;  %vm158_vm0 = vcmp.lt.s32.totalorder %v456_v17, 3  ;;  %207 = vst [vmem:[#allocation2 + $0x20] sm:$0xff] %v206_v37  ;;  %v168_v43 = vld [vmem:[#allocation0 + $0x1f] ss:$-1 sm:$0xff] }
  0x15   :  { %165 = vst [vmem:[#allocation2 + $0x8] sm:$0xff] %v164_v34  ;;  %179 = vst [vmem:[#allocation2 + $0x10] sm:$0xff] %v178_v35  ;;  %v154_v42 = vld [vmem:[#allocation0 + $0xf] ss:$-1 sm:$0xff]  ;;  %v169_v46 = vrot.slane %v168_v43, 5 }
  0x16   :  { %193 = vst [vmem:[#allocation2 + $0x18] sm:$0xff] %v192_v36  ;;  %151 = vst [vmem:[#allocation2] sm:$0xff] %v150_v38  ;;  %v182_v44 = vld [vmem:[#allocation0 + $0x2f] ss:$-1 sm:$0xff]  ;;  %v155_v45 = vrot.slane %v154_v42, 5 }
  0x17   :  { %221 = vst [vmem:[#allocation2 + $0x28] sm:$0xff] %v220_v39  ;;  %235 = vst [vmem:[#allocation2 + $0x30] sm:$0xff] %v234_v40  ;;  %v183_v47 = vrot.slane %v182_v44, 5  ;;  %v196_v48 = vld [vmem:[#allocation0 + $0x3f] ss:$-1 sm:$0xff] }
  0x18   :  { %249 = vst [vmem:[#allocation2 + $0x38] sm:$0xff] %v248_v41  ;;  %v197_v49 = vrot.slane %v196_v48, 5  ;;  %v210_v50 = vld [vmem:[#allocation0 + $0x4f] ss:$-1 sm:$0xff]  ;;  %v224_v51 = vld [vmem:[#allocation0 + $0x5f] ss:$-1 sm:$0xff] }
  0x19   :  { %159 = vst.msk [vmem:[#allocation2] sm:$0xff] %vm158_vm0, %v155_v45  ;;  %173 = vst.msk [vmem:[#allocation2 + $0x8] sm:$0xff] %vm158_vm0, %v169_v46  ;;  %v211_v52 = vrot.slane %v210_v50, 5  ;;  %v225_v53 = vrot.slane %v224_v51, 5  ;;  %v238_v54 = vld [vmem:[#allocation0 + $0x6f] ss:$-1 sm:$0xff] }
  0x1a   :  { %187 = vst.msk [vmem:[#allocation2 + $0x10] sm:$0xff] %vm158_vm0, %v183_v47  ;;  %v252_v55 = vld [vmem:[#allocation0 + $0x7f] ss:$-1 sm:$0xff]  ;;  %201 = vst.msk [vmem:[#allocation2 + $0x18] sm:$0xff] %vm158_vm0, %v197_v49  ;;  %v239_v56 = vrot.slane %v238_v54, 5 }
  0x1b   :  { %v253_v57 = vrot.slane %v252_v55, 5  ;;  %215 = vst.msk [vmem:[#allocation2 + $0x20] sm:$0xff] %vm158_vm0, %v211_v52  ;;  %229 = vst.msk [vmem:[#allocation2 + $0x28] sm:$0xff] %vm158_vm0, %v225_v53 }
  0x1c   :  { %243 = vst.msk [vmem:[#allocation2 + $0x30] sm:$0xff] %vm158_vm0, %v239_v56 }
  0x1d   :  { %257 = vst.msk [vmem:[#allocation2 + $0x38] sm:$0xff] %vm158_vm0, %v253_v57 }
  0x20   :  { %v261_v58 = vld [vmem:[#allocation2] sm:$0xf]  ;;  %v265_v59 = vld [vmem:[#allocation2 + $0x8] sm:$0xf] }
  0x21   :  { %v270_v60 = vld [vmem:[#allocation2 + $0x10] sm:$0xf]  ;;  %263 = vst [vmem:[#allocation3] sm:$0xf] %v261_v58  ;;  %268 = vst [vmem:[#allocation3 + $0x4] sm:$0xf] %v265_v59 }
  0x22   :  { %274 = vst [vmem:[#allocation3 + $0x8] sm:$0xf] %v270_v60  ;;  %v276_v61 = vld [vmem:[#allocation2 + $0x18] sm:$0xf]  ;;  %v282_v62 = vld [vmem:[#allocation2 + $0x20] sm:$0xf] }
  0x23   :  { %280 = vst [vmem:[#allocation3 + $0xc] sm:$0xf] %v276_v61  ;;  %v288_v63 = vld [vmem:[#allocation2 + $0x28] sm:$0xf]  ;;  %286 = vst [vmem:[#allocation3 + $0x10] sm:$0xf] %v282_v62 }
  0x24   :  { %292 = vst [vmem:[#allocation3 + $0x14] sm:$0xf] %v288_v63  ;;  %v294_v0 = vld [vmem:[#allocation2 + $0x30] sm:$0xf]  ;;  %v300_v1 = vld [vmem:[#allocation2 + $0x38] sm:$0xf] }
  0x25   :  { %298 = vst [vmem:[#allocation3 + $0x18] sm:$0xf] %v294_v0  ;;  %304 = vst [vmem:[#allocation3 + $0x1c] sm:$0xf] %v300_v1 }
  0x28   :  { %v320_v2 = vld [vmem:[#allocation3] sm:$0xff]  }
  0x29   :  { %321 = vst [vmem:[%s488_s1] sm:$0xff] %v320_v2  }
  0x2a   :  { %v324_v3 = vld [vmem:[#allocation3 + $0x8] sm:$0xff]  }
  0x2b   :  { %325 = vst [vmem:[%s488_s1 + $0x8] sm:$0xff] %v324_v3   ;;  %v328_v4 = vld [vmem:[#allocation3 + $0x10] sm:$0xff]  }
  0x2c   :  { %329 = vst [vmem:[%s488_s1 + $0x10] sm:$0xff] %v328_v4   ;;  %v332_v5 = vld [vmem:[#allocation3 + $0x18] sm:$0xff]  }
  0x2d   :  { %333 = vst [vmem:[%s488_s1 + $0x18] sm:$0xff] %v332_v5  }

// kernel: fwd.23
= control target key start
LH: loop header
LB: loop body
LE: loop exit
PB: predicated region body
PF: predicated region fallthrough
CT: control target
= control target key end

     0   :  { %v100_v0 = vmov 0.0   ;;  %vm101_vm0 = vmmov 0   ;;  %v102_v6 = vmov 0   ;;  %vm38_vm1 = vcmask 1041408   ;;  %s151_s1 = inlined_call_operand.vmem [shape: f32[4,128], index: 1, kind: input, shape index: {}]   ;;  %s152_s2 = inlined_call_operand.vmem [shape: f32[4,128], index: 2, kind: input, shape index: {}]   ;;  %s153_s3 = inlined_call_operand.vmem [shape: f32[4,128], index: 3, kind: input, shape index: {}]   ;;  %s154_s4 = inlined_call_operand.vmem [shape: f32[8,1], index: 4, kind: input, shape index: {}]   ;;  %s155_s0 = inlined_call_operand.vmem [shape: bf16[8,4], index: 0, kind: input, shape index: {}]   ;;  %s156_s5 = inlined_call_operand.vmem [shape: f32[8,128], index: 5, kind: output, shape index: {}]  }
   0x1   :  { %90 = vmatprep.subr.bf16.mxu0 %v100_v0  ;;  %v21_v1 = vld [vmem:[%s151_s1] sm:$0xf]  ;;  %92 = vmatprep.mubr.msk.bf16.mxu0 %vm101_vm0, %v100_v0  ;;  %vm34_vm2 = vcmask 31744  }
   0x2   :  { %v22_v2 = vld [vmem:[%s152_s2] sm:$0xf]  ;;  %99 = vset.pattern.permute.xlu0 %v102_v6 }
   0x3   :  { %v24_v3 = vld [vmem:[%s153_s3] sm:$0xf]  ;;  %v23_v4 = vadd.f32 %v22_v2, %v21_v1 }
   0x4   :  { %v28_v5 = vld [vmem:[%s154_s4] sm:$0xff] }
   0x5   :  { %v25_v7 = vadd.f32 %v24_v3, %v23_v4  ;;  %31 = vperm.xlu0 %99, %v28_v5   ;;  %v26_v10 = vld [vmem:[%s155_s0] sm:$0xf] }
   0x7   :  { %v27_v8 = vpack.c.bf16 %v25_v7, %v25_v7 }
   0x9   :  { %v40_v9 = vsel %vm38_vm1, %v27_v8, 0 }
   0xa   :  { %91 = vmatpush3.bf16.msra.mxu0 %v40_v9 }
   0xd   :  { %93 = vmatmul.mubr.msk.bf16.vlgmr.msra.gmra.mrb[0].mxu0 %vm34_vm2, %v26_v10 }
  0x84   :  { %v32_v11 = vpop.permute.xlu0 %31 }
  0xe0   :  { %v76_v12 = vpop.f32.mrb[0].mxu0 }
  0xe1   :  { %v77_v13 = vadd.f32 %v76_v12, %v32_v11  ;;  %v94_v14 = vpop.f32.mrb[1].mxu0 }
  0xe2   :  { %v79_v15 = vpop.f32.mrb[2].mxu0 }
  0xe3   :  { %82 = vst [vmem:[%s156_s5] sm:$0xff] %v77_v13  ;;  %v95_v16 = vpop.f32.mrb[3].mxu0 }

// kernel: fwd.16
= control target key start
LH: loop header
LB: loop body
LE: loop exit
PB: predicated region body
PF: predicated region fallthrough
CT: control target
= control target key end

     0   :  { %v162_v0 = vmov 0.0   ;;  %vm163_vm0 = vmmov 0   ;;  %v164_v2 = vmov 0   ;;  %vm74_vm1 = vcmask 1043456   ;;  %s215_s1 = inlined_call_operand.vmem [shape: bf16[72,128], index: 1, kind: input, shape index: {}]   ;;  %s216_s2 = inlined_call_operand.vmem [shape: f32[16,1], index: 2, kind: input, shape index: {}]   ;;  %s217_s0 = inlined_call_operand.vmem [shape: bf16[16,72], index: 0, kind: input, shape index: {}]   ;;  %s218_s3 = inlined_call_operand.vmem [shape: f32[16,128], index: 3, kind: output, shape index: {}]  }
   0x1   :  { %138 = vmatprep.subr.bf16.mxu0 %v162_v0  ;;  %v156_v1 = vld [vmem:[%s215_s1] sm:$0xff]   ;;  %148 = vmatprep.mubr.msk.bf16.mxu0 %vm163_vm0, %v162_v0  ;;  %v157_v3 = vld [vmem:[%s215_s1 + $0x8] sm:$0xff]   ;;  %v158_v5 = vld [vmem:[%s215_s1 + $0x10] sm:$0xff]   ;;  %vm70_vm2 = vcmask 588800  }
   0x2   :  { %155 = vset.pattern.permute.xlu0 %v164_v2  ;;  %139 = vmatpush3.bf16.msra.mxu0 %v156_v1  ;;  %v26_v4 = vld [vmem:[%s216_s2] sm:$0xff]  ;;  %v27_v6 = vld [vmem:[%s216_s2 + $0x8] sm:$0xff]  ;;  %v159_v7 = vld [vmem:[%s215_s1 + $0x18] sm:$0xff]  }
   0x3   :  { %140 = vmatprep.subr.bf16.mxu0 %v162_v0  ;;  %30 = vperm.xlu0 %155, %v26_v4   ;;  %v160_v8 = vld [vmem:[%s215_s1 + $0x20] ss:$0 sps:$4 sm:$0xff]  }
   0x4   :  { %v76_v9 = vsel %vm74_vm1, %v160_v8, 0  ;;  %v161_v10 = vld [vmem:[%s217_s0] sm:$0xff]  }
   0x6   :  { %141 = vmatpush3.bf16.msra.mxu0 %v157_v3 }
   0x7   :  { %142 = vmatprep.subr.bf16.mxu0 %v162_v0  ;;  %35 = vperm.xlu0 %155, %v27_v6  }
   0xa   :  { %143 = vmatpush3.bf16.msra.mxu0 %v158_v5 }
   0xb   :  { %144 = vmatprep.subr.bf16.mxu0 %v162_v0 }
   0xe   :  { %145 = vmatpush3.bf16.msra.mxu0 %v159_v7 }
   0xf   :  { %146 = vmatprep.subr.bf16.mxu0 %v162_v0 }
  0x12   :  { %147 = vmatpush3.bf16.msra.mxu0 %v76_v9 }
  0x15   :  { %149 = vmatmul.mubr.msk.bf16.vlgmr.msra.gmra.mrb[0].mxu0 %vm70_vm2, %v161_v10 }
  0x82   :  { %v31_v11 = vpop.permute.xlu0 %30 }
  0x86   :  { %v36_v15 = vpop.permute.xlu0 %35 }
  0xe8   :  { %v112_v12 = vpop.f32.mrb[0].mxu0 }
  0xe9   :  { %v113_v13 = vadd.f32 %v112_v12, %v31_v11  ;;  %v150_v14 = vpop.f32.mrb[1].mxu0 }
  0xea   :  { %v115_v16 = vpop.f32.mrb[2].mxu0 }
  0xeb   :  { %119 = vst [vmem:[%s218_s3] sm:$0xff] %v113_v13  ;;  %v116_v17 = vadd.f32 %v115_v16, %v36_v15  ;;  %v151_v18 = vpop.f32.mrb[3].mxu0 }
  0xed   :  { %120 = vst [vmem:[%s218_s3 + $0x8] sm:$0xff] %v116_v17 }

// kernel: fwd.24
= control target key start
LH: loop header
LB: loop body
LE: loop exit
PB: predicated region body
PF: predicated region fallthrough
CT: control target
= control target key end

     0   :  { %vm23_vm0 = vcmask 523264   ;;  %s166_s0 = inlined_call_operand.vmem [shape: f32[16,64], index: 0, kind: input, shape index: {}]   ;;  %s167_s1 = inlined_call_operand.vmem [shape: f32[16,64], index: 1, kind: input, shape index: {}]   ;;  %s168_s2 = inlined_call_operand.vmem [shape: f32[1,64], index: 2, kind: input, shape index: {}]   ;;  %s169_s3 = inlined_call_operand.vmem [shape: f32[1,64], index: 3, kind: input, shape index: {}]   ;;  %s170_s4 = inlined_call_operand.vmem [shape: f32[16,64], index: 4, kind: output, shape index: {}]  }
   0x1   :  { %v17_v0 = vld [vmem:[%s166_s0] sm:$0xff]  ;;  %v18_v2 = vld [vmem:[%s166_s0 + $0x8] sm:$0xff] }
   0x2   :  { %v19_v1 = vld [vmem:[%s167_s1] sm:$0xff]  ;;  %v20_v4 = vld [vmem:[%s167_s1 + $0x8] sm:$0xff] }
   0x3   :  { %v21_v3 = vadd.f32 %v19_v1, %v17_v0  ;;  %v22_v5 = vadd.f32 %v20_v4, %v18_v2  ;;  %v95_v25 = vld [vmem:[%s168_s2] ss:$0 sm:$0xff] }
   0x4   :  { %v96_v27 = vld [vmem:[%s169_s3] ss:$0 sm:$0xff] }
   0x5   :  { %v24_v6 = vsel %vm23_vm0, %v21_v3, 0.0  ;;  %v27_v7 = vsel %vm23_vm0, %v22_v5, 0.0 }
   0x6   :  { %25 = vadd.xlane.f32.xlu0 %v24_v6 }
   0xa   :  { %28 = vadd.xlane.f32.xlu0 %v27_v7 }
  0x93   :  { %v26_v8 = vpop.xlane.xlu0 %25 }
  0x94   :  { %v31_v9 = vmul.f32 0.015625, %v26_v8 }
  0x96   :  { %v33_v10 = vsub.f32 %v21_v3, %v31_v9 }
  0x97   :  { %v29_v11 = vpop.xlane.xlu0 %28 }
  0x98   :  { %v32_v12 = vmul.f32 0.015625, %v29_v11  ;;  %v35_v13 = vmul.f32 %v33_v10, %v33_v10 }
  0x9a   :  { %v34_v14 = vsub.f32 %v22_v5, %v32_v12  ;;  %v37_v15 = vsel %vm23_vm0, %v35_v13, 0.0 }
  0x9b   :  { %38 = vadd.xlane.f32.xlu1 %v37_v15 }
  0x9c   :  { %v36_v16 = vmul.f32 %v34_v14, %v34_v14 }
  0x9e   :  { %v40_v17 = vsel %vm23_vm0, %v36_v16, 0.0 }
  0x9f   :  { %41 = vadd.xlane.f32.xlu1 %v40_v17 }
 0x128   :  { %v39_v18 = vpop.xlane.xlu1 %38 }
 0x129   :  { %v43_v19 = vmul.f32 0.015625, %v39_v18 }
 0x12b   :  { %v45_v20 = vadd.f32 1e-05, %v43_v19 }
 0x12c   :  { %v42_v21 = vpop.xlane.xlu1 %41 }
 0x12d   :  { %99 = vrsqrt.f32 %v45_v20  ;;  %v44_v22 = vmul.f32 0.015625, %v42_v21 }
 0x12f   :  { %v46_v23 = vadd.f32 1e-05, %v44_v22 }
 0x131   :  { %101 = vrsqrt.f32 %v46_v23 }
 0x137   :  { %v100_v24 = vpop.eup %99 }
 0x138   :  { %v49_v26 = vmul.f32 %v100_v24, %v33_v10 }
 0x13a   :  { %v58_v28 = vmul.f32 %v95_v25, %v49_v26 }
 0x13b   :  { %v102_v29 = vpop.eup %101 }
 0x13c   :  { %v67_v30 = vadd.f32 %v96_v27, %v58_v28  ;;  %v50_v31 = vmul.f32 %v102_v29, %v34_v14 }
 0x13e   :  { %v69_v32 = vmin.f32 %v67_v30, 20.0  ;;  %v59_v33 = vmul.f32 %v95_v25, %v50_v31 }
 0x140   :  { %v71_v34 = vmul.f32 1.442695, %v69_v32  ;;  %v68_v35 = vadd.f32 %v96_v27, %v59_v33 }
 0x142   :  { %103 = vpow2.f32 %v71_v34  ;;  %v70_v36 = vmin.f32 %v68_v35, 20.0 }
 0x144   :  { %v73_v37 = vmul.f32 1.442695, %v70_v36 }
 0x146   :  { %105 = vpow2.f32 %v73_v37 }
 0x14c   :  { %v104_v38 = vpop.eup %103 }
 0x14d   :  { %v75_v39 = vadd.f32 1.0, %v104_v38 }
 0x14f   :  { %v77_v40 = vmul.f32 %v75_v39, %v75_v39 }
 0x150   :  { %v106_v41 = vpop.eup %105 }
 0x151   :  { %v83_v42 = vadd.f32 1.0, %v77_v40  ;;  %v76_v43 = vadd.f32 1.0, %v106_v41  ;;  %v97_v46 = vadd.f32 -1.0, %v77_v40 }
 0x153   :  { %107 = vrcp.f32 %v83_v42  ;;  %v78_v44 = vmul.f32 %v76_v43, %v76_v43  ;;  %v81_v47 = vmul.f32 %v97_v46, %v67_v30 }
 0x155   :  { %v84_v45 = vadd.f32 1.0, %v78_v44  ;;  %v98_v48 = vadd.f32 -1.0, %v78_v44 }
 0x157   :  { %109 = vrcp.f32 %v84_v45  ;;  %v82_v51 = vmul.f32 %v98_v48, %v68_v35 }
 0x15d   :  { %v108_v49 = vpop.eup %107 }
 0x15e   :  { %v87_v50 = vmul.f32 %v108_v49, %v81_v47 }
 0x160   :  { %89 = vst.msk [vmem:[%s170_s4] sm:$0xff] %vm23_vm0, %v87_v50 }
 0x161   :  { %v110_v52 = vpop.eup %109 }
 0x162   :  { %v88_v53 = vmul.f32 %v110_v52, %v82_v51 }
 0x164   :  { %90 = vst.msk [vmem:[%s170_s4 + $0x8] sm:$0xff] %vm23_vm0, %v88_v53 }

// kernel: fwd.17
= control target key start
LH: loop header
LB: loop body
LE: loop exit
PB: predicated region body
PF: predicated region fallthrough
CT: control target
= control target key end

     0   :  { %v146_v0 = vmov 0.0   ;;  %vm147_vm0 = vmmov 0   ;;  %v148_v2 = vmov 0   ;;  %vm62_vm1 = vcmask 1043456   ;;  %s193_s1 = inlined_call_operand.vmem [shape: bf16[72,128], index: 1, kind: input, shape index: {}]   ;;  %s194_s2 = inlined_call_operand.vmem [shape: f32[8,1], index: 2, kind: input, shape index: {}]   ;;  %s195_s0 = inlined_call_operand.vmem [shape: bf16[8,72], index: 0, kind: input, shape index: {}]   ;;  %s196_s3 = inlined_call_operand.vmem [shape: f32[8,128], index: 3, kind: output, shape index: {}]  }
   0x1   :  { %123 = vmatprep.subr.bf16.mxu0 %v146_v0  ;;  %v141_v1 = vld [vmem:[%s193_s1] sm:$0xff]   ;;  %133 = vmatprep.mubr.msk.bf16.mxu0 %vm147_vm0, %v146_v0  ;;  %v142_v3 = vld [vmem:[%s193_s1 + $0x8] sm:$0xff]   ;;  %v143_v5 = vld [vmem:[%s193_s1 + $0x10] sm:$0xff]   ;;  %vm58_vm2 = vcmask 588800  }
   0x2   :  { %140 = vset.pattern.permute.xlu0 %v148_v2  ;;  %124 = vmatpush3.bf16.msra.mxu0 %v141_v1  ;;  %v25_v4 = vld [vmem:[%s194_s2] sm:$0xff]  ;;  %v144_v6 = vld [vmem:[%s193_s1 + $0x18] sm:$0xff]  }
   0x3   :  { %125 = vmatprep.subr.bf16.mxu0 %v146_v0  ;;  %28 = vperm.xlu0 %140, %v25_v4   ;;  %v145_v7 = vld [vmem:[%s193_s1 + $0x20] ss:$0 sps:$4 sm:$0xff]  }
   0x4   :  { %v64_v8 = vsel %vm62_vm1, %v145_v7, 0  ;;  %v24_v9 = vld [vmem:[%s195_s0] sm:$0xf] }
   0x6   :  { %126 = vmatpush3.bf16.msra.mxu0 %v142_v3 }
   0x7   :  { %127 = vmatprep.subr.bf16.mxu0 %v146_v0 }
   0xa   :  { %128 = vmatpush3.bf16.msra.mxu0 %v143_v5 }
   0xb   :  { %129 = vmatprep.subr.bf16.mxu0 %v146_v0 }
   0xe   :  { %130 = vmatpush3.bf16.msra.mxu0 %v144_v6 }
   0xf   :  { %131 = vmatprep.subr.bf16.mxu0 %v146_v0 }
  0x12   :  { %132 = vmatpush3.bf16.msra.mxu0 %v64_v8 }
  0x15   :  { %134 = vmatmul.mubr.msk.bf16.vlgmr.msra.gmra.mrb[0].mxu0 %vm58_vm2, %v24_v9 }
  0x82   :  { %v29_v10 = vpop.permute.xlu0 %28 }
  0xe8   :  { %v100_v11 = vpop.f32.mrb[0].mxu0 }
  0xe9   :  { %v101_v12 = vadd.f32 %v100_v11, %v29_v10  ;;  %v135_v13 = vpop.f32.mrb[1].mxu0 }
  0xea   :  { %v103_v14 = vpop.f32.mrb[2].mxu0 }
  0xeb   :  { %106 = vst [vmem:[%s196_s3] sm:$0xff] %v101_v12  ;;  %v136_v15 = vpop.f32.mrb[3].mxu0 }

// kernel: fwd.19
= control target key start
LH: loop header
LB: loop body
LE: loop exit
PB: predicated region body
PF: predicated region fallthrough
CT: control target
= control target key end

     0   :  { %v198_v1 = vmov 0   ;;  %vm89_vm0 = vcmask 588800   ;;  %vm96_vm1 = vcmask 1043456   ;;  %s266_s1 = inlined_call_operand.vmem [shape: bf16[72,128], index: 1, kind: input, shape index: {}]   ;;  %s267_s0 = inlined_call_operand.vmem [shape: bf16[32,72], index: 0, kind: input, shape index: {}]   ;;  %s268_s2 = inlined_call_operand.vmem [shape: f32[32,1], index: 2, kind: input, shape index: {}]   ;;  %s269_s3 = inlined_call_operand.vmem [shape: f32[32,128], index: 3, kind: output, shape index: {}]  }
   0x1   :  { %v191_v0 = vld [vmem:[%s266_s1] sm:$0xff]   ;;  %190 = vset.pattern.permute.xlu1 %v198_v1  ;;  %189 = vset.pattern.permute.xlu0 %v198_v1  ;;  %v192_v2 = vld [vmem:[%s266_s1 + $0x8] sm:$0xff]   ;;  %v193_v3 = vld [vmem:[%s266_s1 + $0x10] sm:$0xff]  }
   0x2   :  { %173 = vmatprep.subr.bf16.mxu0 %v191_v0  ;;  %v196_v4 = vld [vmem:[%s267_s0] sm:$0xff]   ;;  %v30_v5 = vld [vmem:[%s268_s2 + $0x10] sm:$0xff]  ;;  %v194_v7 = vld [vmem:[%s266_s1 + $0x18] sm:$0xff]  }
   0x3   :  { %174 = vmatpush3.bf16.msra.mxu0 %v191_v0  ;;  %183 = vmatprep.mubr.msk.bf16.mxu0 %vm89_vm0, %v196_v4  ;;  %v28_v6 = vld [vmem:[%s268_s2] sm:$0xff]  ;;  %v31_v8 = vld [vmem:[%s268_s2 + $0x18] sm:$0xff]  ;;  %v29_v9 = vld [vmem:[%s268_s2 + $0x8] sm:$0xff] }
   0x4   :  { %175 = vmatprep.subr.bf16.mxu0 %v192_v2  ;;  %44 = vperm.xlu1 %190, %v30_v5   ;;  %v195_v10 = vld [vmem:[%s266_s1 + $0x20] ss:$0 sps:$4 sm:$0xff]   ;;  %v197_v12 = vld [vmem:[%s267_s0 + $0x8] sm:$0xff]  }
   0x5   :  { %34 = vperm.xlu0 %189, %v28_v6   ;;  %v98_v11 = vsel %vm96_vm1, %v195_v10, 0 }
   0x7   :  { %176 = vmatpush3.bf16.msra.mxu0 %v192_v2 }
   0x8   :  { %177 = vmatprep.subr.bf16.mxu0 %v193_v3  ;;  %49 = vperm.xlu1 %190, %v31_v8  }
   0x9   :  { %39 = vperm.xlu0 %189, %v29_v9  }
   0xb   :  { %178 = vmatpush3.bf16.msra.mxu0 %v193_v3 }
   0xc   :  { %179 = vmatprep.subr.bf16.mxu0 %v194_v7 }
   0xf   :  { %180 = vmatpush3.bf16.msra.mxu0 %v194_v7 }
  0x10   :  { %187 = vmatprep.subr.msk.bf16.mxu0 %vm96_vm1, %v195_v10 }
  0x13   :  { %182 = vmatpush3.bf16.msra.mxu0 %v98_v11 }
  0x16   :  { %184 = vmatmul.mubr.msk.bf16.vlgmr.msra.gmra.mrb[0].mxu0 %vm89_vm0, %v197_v12 }
  0x83   :  { %v45_v13 = vpop.permute.xlu1 %44 }
  0x84   :  { %v35_v14 = vpop.permute.xlu0 %34 }
  0x87   :  { %v50_v18 = vpop.permute.xlu1 %49 }
  0x88   :  { %v40_v21 = vpop.permute.xlu0 %39 }
  0xe9   :  { %v185_v15 = vpop.f32.mrb[0].mxu0 }
  0xea   :  { %v143_v16 = vadd.f32 %v185_v15, %v45_v13  ;;  %v134_v17 = vpop.f32.mrb[1].mxu0 }
  0xeb   :  { %v135_v19 = vadd.f32 %v134_v17, %v35_v14  ;;  %v186_v20 = vpop.f32.mrb[2].mxu0 }
  0xec   :  { %151 = vst [vmem:[%s269_s3 + $0x10] sm:$0xff] %v143_v16  ;;  %v146_v22 = vadd.f32 %v186_v20, %v50_v18  ;;  %v137_v23 = vpop.f32.mrb[3].mxu0 }
  0xed   :  { %149 = vst [vmem:[%s269_s3] sm:$0xff] %v135_v19  ;;  %v138_v24 = vadd.f32 %v137_v23, %v40_v21 }
  0xee   :  { %152 = vst [vmem:[%s269_s3 + $0x18] sm:$0xff] %v146_v22 }
  0xef   :  { %150 = vst [vmem:[%s269_s3 + $0x8] sm:$0xff] %v138_v24 }

// kernel: fwd.26
= control target key start
LH: loop header
LB: loop body
LE: loop exit
PB: predicated region body
PF: predicated region fallthrough
CT: control target
= control target key end

     0   :  { %vm32_vm0 = vcmask 523264   ;;  %s290_s0 = inlined_call_operand.vmem [shape: f32[32,64], index: 0, kind: input, shape index: {}]   ;;  %s291_s1 = inlined_call_operand.vmem [shape: f32[32,64], index: 1, kind: input, shape index: {}]   ;;  %s292_s2 = inlined_call_operand.vmem [shape: f32[1,64], index: 2, kind: input, shape index: {}]   ;;  %s293_s3 = inlined_call_operand.vmem [shape: f32[1,64], index: 3, kind: input, shape index: {}]   ;;  %s294_s4 = inlined_call_operand.vmem [shape: f32[32,64], index: 4, kind: input, shape index: {}]   ;;  %s295_s5 = inlined_call_operand.vmem [shape: f32[32,64], index: 5, kind: output, shape index: {}]  }
   0x1   :  { %v20_v0 = vld [vmem:[%s290_s0] sm:$0xff]  ;;  %v22_v2 = vld [vmem:[%s290_s0 + $0x10] sm:$0xff]  ;;  %v21_v5 = vld [vmem:[%s290_s0 + $0x8] sm:$0xff] }
   0x2   :  { %v24_v1 = vld [vmem:[%s291_s1] sm:$0xff]  ;;  %v26_v4 = vld [vmem:[%s291_s1 + $0x10] sm:$0xff]  ;;  %v25_v6 = vld [vmem:[%s291_s1 + $0x8] sm:$0xff] }
   0x3   :  { %v28_v3 = vadd.f32 %v24_v1, %v20_v0  ;;  %v30_v7 = vadd.f32 %v26_v4, %v22_v2  ;;  %v29_v8 = vadd.f32 %v25_v6, %v21_v5  ;;  %v23_v9 = vld [vmem:[%s290_s0 + $0x18] sm:$0xff]  ;;  %v164_v49 = vld [vmem:[%s292_s2] ss:$0 sm:$0xff] }
   0x4   :  { %v27_v10 = vld [vmem:[%s291_s1 + $0x18] sm:$0xff]  ;;  %v165_v51 = vld [vmem:[%s293_s3] ss:$0 sm:$0xff] }
   0x5   :  { %v33_v11 = vsel %vm32_vm0, %v28_v3, 0.0  ;;  %v31_v12 = vadd.f32 %v27_v10, %v23_v9  ;;  %v39_v13 = vsel %vm32_vm0, %v30_v7, 0.0  ;;  %v36_v14 = vsel %vm32_vm0, %v29_v8, 0.0 }
   0x6   :  { %34 = vadd.xlane.f32.xlu0 %v33_v11  ;;  %40 = vadd.xlane.f32.xlu1 %v39_v13 }
   0x7   :  { %v42_v15 = vsel %vm32_vm0, %v31_v12, 0.0 }
   0xa   :  { %37 = vadd.xlane.f32.xlu0 %v36_v14  ;;  %43 = vadd.xlane.f32.xlu1 %v42_v15 }
  0x93   :  { %v35_v16 = vpop.xlane.xlu0 %34  ;;  %v41_v18 = vpop.xlane.xlu1 %40 }
  0x94   :  { %v46_v17 = vmul.f32 0.015625, %v35_v16  ;;  %v48_v19 = vmul.f32 0.015625, %v41_v18 }
  0x96   :  { %v50_v20 = vsub.f32 %v28_v3, %v46_v17  ;;  %v52_v21 = vsub.f32 %v30_v7, %v48_v19 }
  0x97   :  { %v38_v22 = vpop.xlane.xlu0 %37  ;;  %v44_v24 = vpop.xlane.xlu1 %43 }
  0x98   :  { %v47_v23 = vmul.f32 0.015625, %v38_v22  ;;  %v54_v25 = vmul.f32 %v50_v20, %v50_v20  ;;  %v49_v26 = vmul.f32 0.015625, %v44_v24  ;;  %v56_v27 = vmul.f32 %v52_v21, %v52_v21 }
  0x9a   :  { %v51_v28 = vsub.f32 %v29_v8, %v47_v23  ;;  %v58_v29 = vsel %vm32_vm0, %v54_v25, 0.0  ;;  %v53_v30 = vsub.f32 %v31_v12, %v49_v26  ;;  %v64_v31 = vsel %vm32_vm0, %v56_v27, 0.0 }
  0x9b   :  { %59 = vadd.xlane.f32.xlu0 %v58_v29 }
  0x9c   :  { %v55_v32 = vmul.f32 %v51_v28, %v51_v28  ;;  %v57_v33 = vmul.f32 %v53_v30, %v53_v30 }
  0x9e   :  { %v61_v34 = vsel %vm32_vm0, %v55_v32, 0.0  ;;  %v67_v35 = vsel %vm32_vm0, %v57_v33, 0.0 }
  0x9f   :  { %65 = vadd.xlane.f32.xlu0 %v64_v31  ;;  %62 = vadd.xlane.f32.xlu1 %v61_v34 }
  0xa3   :  { %68 = vadd.xlane.f32.xlu1 %v67_v35 }
 0x128   :  { %v60_v36 = vpop.xlane.xlu0 %59 }
 0x129   :  { %v70_v37 = vmul.f32 0.015625, %v60_v36 }
 0x12b   :  { %v74_v38 = vadd.f32 1e-05, %v70_v37  ;;  %v149_v37 = vld [vmem:[%s294_s4 + $0x8] sm:$0xff] }
 0x12c   :  { %v63_v39 = vpop.xlane.xlu1 %62  ;;  %v66_v40 = vpop.xlane.xlu0 %65 }
 0x12d   :  { %170 = vrsqrt.f32 %v74_v38  ;;  %v71_v41 = vmul.f32 0.015625, %v63_v39  ;;  %v72_v42 = vmul.f32 0.015625, %v66_v40 }
 0x12f   :  { %v75_v43 = vadd.f32 1e-05, %v71_v41  ;;  %v76_v44 = vadd.f32 1e-05, %v72_v42  ;;  %v150_v41 = vld [vmem:[%s294_s4 + $0x10] sm:$0xff] }
 0x130   :  { %v69_v45 = vpop.xlane.xlu1 %68 }
 0x131   :  { %172 = vrsqrt.f32 %v75_v43  ;;  %v73_v46 = vmul.f32 0.015625, %v69_v45 }
 0x132   :  { %174 = vrsqrt.f32 %v76_v44 }
 0x133   :  { %v77_v47 = vadd.f32 1e-05, %v73_v46 }
 0x135   :  { %176 = vrsqrt.f32 %v77_v47  ;;  %v151_v47 = vld [vmem:[%s294_s4 + $0x18] sm:$0xff] }
 0x137   :  { %v171_v48 = vpop.eup %170 }
 0x138   :  { %v82_v50 = vmul.f32 %v171_v48, %v50_v20 }
 0x13a   :  { %v93_v52 = vmul.f32 %v164_v49, %v82_v50 }
 0x13b   :  { %v173_v53 = vpop.eup %172 }
 0x13c   :  { %v175_v54 = vpop.eup %174  ;;  %v104_v55 = vadd.f32 %v165_v51, %v93_v52  ;;  %v83_v56 = vmul.f32 %v173_v53, %v51_v28 }
 0x13d   :  { %v84_v57 = vmul.f32 %v175_v54, %v52_v21 }
 0x13e   :  { %v108_v58 = vmin.f32 %v104_v55, 20.0  ;;  %v94_v59 = vmul.f32 %v164_v49, %v83_v56 }
 0x13f   :  { %v177_v60 = vpop.eup %176  ;;  %v95_v61 = vmul.f32 %v164_v49, %v84_v57 }
 0x140   :  { %v112_v62 = vmul.f32 1.442695, %v108_v58  ;;  %v105_v63 = vadd.f32 %v165_v51, %v94_v59  ;;  %v85_v0 = vmul.f32 %v177_v60, %v53_v30  ;;  %v148_v30 = vld [vmem:[%s294_s4] sm:$0xff] }
 0x141   :  { %v106_v1 = vadd.f32 %v165_v51, %v95_v61 }
 0x142   :  { %178 = vpow2.f32 %v112_v62  ;;  %v109_v2 = vmin.f32 %v105_v63, 20.0  ;;  %v96_v3 = vmul.f32 %v164_v49, %v85_v0 }
 0x143   :  { %v110_v4 = vmin.f32 %v106_v1, 20.0 }
 0x144   :  { %v114_v5 = vmul.f32 1.442695, %v109_v2  ;;  %v107_v6 = vadd.f32 %v165_v51, %v96_v3 }
 0x145   :  { %v116_v7 = vmul.f32 1.442695, %v110_v4 }
 0x146   :  { %180 = vpow2.f32 %v114_v5  ;;  %v111_v8 = vmin.f32 %v107_v6, 20.0 }
 0x147   :  { %182 = vpow2.f32 %v116_v7 }
 0x148   :  { %v118_v9 = vmul.f32 1.442695, %v111_v8 }
 0x14a   :  { %184 = vpow2.f32 %v118_v9 }
 0x14c   :  { %v179_v10 = vpop.eup %178 }
 0x14d   :  { %v120_v11 = vadd.f32 1.0, %v179_v10 }
 0x14f   :  { %v124_v12 = vmul.f32 %v120_v11, %v120_v11 }
 0x150   :  { %v181_v13 = vpop.eup %180 }
 0x151   :  { %v183_v14 = vpop.eup %182  ;;  %v136_v15 = vadd.f32 1.0, %v124_v12  ;;  %v121_v16 = vadd.f32 1.0, %v181_v13  ;;  %v166_v25 = vadd.f32 -1.0, %v124_v12 }
 0x152   :  { %v122_v17 = vadd.f32 1.0, %v183_v14 }
 0x153   :  { %186 = vrcp.f32 %v136_v15  ;;  %v125_v18 = vmul.f32 %v121_v16, %v121_v16  ;;  %v132_v27 = vmul.f32 %v166_v25, %v104_v55 }
 0x154   :  { %v185_v19 = vpop.eup %184  ;;  %v126_v20 = vmul.f32 %v122_v17, %v122_v17 }
 0x155   :  { %v137_v21 = vadd.f32 1.0, %v125_v18  ;;  %v123_v22 = vadd.f32 1.0, %v185_v19  ;;  %v167_v28 = vadd.f32 -1.0, %v125_v18 }
 0x156   :  { %v138_v23 = vadd.f32 1.0, %v126_v20  ;;  %v168_v31 = vadd.f32 -1.0, %v126_v20 }
 0x157   :  { %188 = vrcp.f32 %v137_v21  ;;  %v127_v24 = vmul.f32 %v123_v22, %v123_v22  ;;  %v133_v34 = vmul.f32 %v167_v28, %v105_v63 }
 0x158   :  { %190 = vrcp.f32 %v138_v23  ;;  %v134_v38 = vmul.f32 %v168_v31, %v106_v1 }
 0x159   :  { %v139_v26 = vadd.f32 1.0, %v127_v24  ;;  %v169_v35 = vadd.f32 -1.0, %v127_v24 }
 0x15b   :  { %192 = vrcp.f32 %v139_v26  ;;  %v135_v44 = vmul.f32 %v169_v35, %v107_v6 }
 0x15d   :  { %v187_v29 = vpop.eup %186 }
 0x15e   :  { %v144_v32 = vmul.f32 %v187_v29, %v132_v27 }
 0x160   :  { %v152_v33 = vadd.f32 %v148_v30, %v144_v32 }
 0x161   :  { %v189_v36 = vpop.eup %188 }
 0x162   :  { %v191_v39 = vpop.eup %190  ;;  %156 = vst.msk [vmem:[%s295_s5] sm:$0xff] %vm32_vm0, %v152_v33  ;;  %v145_v40 = vmul.f32 %v189_v36, %v133_v34 }
 0x163   :  { %v146_v42 = vmul.f32 %v191_v39, %v134_v38 }
 0x164   :  { %v153_v43 = vadd.f32 %v149_v37, %v145_v40 }
 0x165   :  { %v193_v45 = vpop.eup %192  ;;  %v154_v46 = vadd.f32 %v150_v41, %v146_v42 }
 0x166   :  { %157 = vst.msk [vmem:[%s295_s5 + $0x8] sm:$0xff] %vm32_vm0, %v153_v43  ;;  %v147_v48 = vmul.f32 %v193_v45, %v135_v44 }
 0x167   :  { %158 = vst.msk [vmem:[%s295_s5 + $0x10] sm:$0xff] %vm32_vm0, %v154_v46 }
 0x168   :  { %v155_v49 = vadd.f32 %v151_v47, %v147_v48 }
 0x16a   :  { %159 = vst.msk [vmem:[%s295_s5 + $0x18] sm:$0xff] %vm32_vm0, %v155_v49 }

// kernel: fwd.27
= control target key start
LH: loop header
LB: loop body
LE: loop exit
PB: predicated region body
PF: predicated region fallthrough
CT: control target
= control target key end

     0   :  { %vm27_vm0 = vcmask 1043456   ;;  %v90_v0 = vmov 0.0   ;;  %vm91_vm1 = vmmov 0   ;;  %v92_v4 = vmov 0   ;;  %s125_s1 = inlined_call_operand.vmem [shape: bf16[8,128], index: 1, kind: input, shape index: {}]   ;;  %s126_s0 = inlined_call_operand.vmem [shape: bf16[8,8], index: 0, kind: input, shape index: {}]   ;;  %s127_s2 = inlined_call_operand.vmem [shape: f32[8,1], index: 2, kind: input, shape index: {}]   ;;  %s128_s3 = inlined_call_operand.vmem [shape: f32[8,128], index: 3, kind: output, shape index: {}]  }
   0x1   :  { %80 = vmatprep.subr.bf16.mxu0 %v90_v0  ;;  %v15_v1 = vld [vmem:[%s125_s1] sm:$0xf]  ;;  %82 = vmatprep.mubr.msk.bf16.mxu0 %vm91_vm1, %v90_v0  ;;  %vm23_vm2 = vcmask 64512  }
   0x2   :  { %v17_v2 = vld [vmem:[%s127_s2] sm:$0xff]  ;;  %v29_v3 = vsel %vm27_vm0, %v15_v1, 0  ;;  %89 = vset.pattern.permute.xlu0 %v92_v4 }
   0x3   :  { %81 = vmatpush3.bf16.msra.mxu0 %v29_v3  ;;  %v16_v5 = vld [vmem:[%s126_s0] sm:$0xf]  ;;  %20 = vperm.xlu0 %89, %v17_v2  }
   0x6   :  { %83 = vmatmul.mubr.msk.bf16.vlgmr.msra.gmra.mrb[0].mxu0 %vm23_vm2, %v16_v5 }
  0x82   :  { %v21_v6 = vpop.permute.xlu0 %20 }
  0xd9   :  { %v65_v7 = vpop.f32.mrb[0].mxu0 }
  0xda   :  { %v66_v8 = vadd.f32 %v65_v7, %v21_v6  ;;  %v84_v9 = vpop.f32.mrb[1].mxu0 }
  0xdb   :  { %v68_v10 = vpop.f32.mrb[2].mxu0 }
  0xdc   :  { %v71_v11 = vmax.f32 %v66_v8, 0.0  ;;  %v85_v12 = vpop.f32.mrb[3].mxu0 }
  0xde   :  { %72 = vst [vmem:[%s128_s3] sm:$0xff] %v71_v11 }

// kernel: fwd.29
= control target key start
LH: loop header
LB: loop body
LE: loop exit
PB: predicated region body
PF: predicated region fallthrough
CT: control target
= control target key end

     0   :  { %v113_v0 = vmov 0.0   ;;  %vm114_vm0 = vmmov 0   ;;  %v115_v3 = vmov 0   ;;  %vm42_vm1 = vcmask 130048   ;;  %s154_s1 = inlined_call_operand.vmem [shape: bf16[16,24], index: 1, kind: input, shape index: {}]   ;;  %s155_s0 = inlined_call_operand.vmem [shape: bf16[16,16], index: 0, kind: input, shape index: {}]   ;;  %s156_s2 = inlined_call_operand.vmem [shape: f32[16,1], index: 2, kind: input, shape index: {}]   ;;  %s157_s3 = inlined_call_operand.vmem [shape: f32[16,24], index: 3, kind: output, shape index: {}]  }
   0x1   :  { %101 = vmatprep.subr.bf16.mxu0 %v113_v0  ;;  %v111_v1 = vld [vmem:[%s154_s1] sm:$0xff]   ;;  %103 = vmatprep.mubr.msk.bf16.mxu0 %vm114_vm0, %v113_v0  ;;  %v20_v5 = vld [vmem:[%s156_s2 + $0x8] sm:$0xff]  ;;  %vm89_vm2 = vcmask 195584  }
   0x2   :  { %v112_v2 = vld [vmem:[%s155_s0] sm:$0xff]   ;;  %110 = vset.pattern.permute.xlu0 %v115_v3  ;;  %102 = vmatpush3.bf16.msra.mxu0 %v111_v1 }
   0x3   :  { %v19_v4 = vld [vmem:[%s156_s2] sm:$0xff] }
   0x4   :  { %23 = vperm.xlu0 %110, %v19_v4  }
   0x5   :  { %104 = vmatmul.mubr.msk.bf16.vlgmr.msra.gmra.mrb[0].mxu0 %vm42_vm1, %v112_v2 }
   0x8   :  { %28 = vperm.xlu0 %110, %v20_v5  }
  0x83   :  { %v24_v6 = vpop.permute.xlu0 %23 }
  0x87   :  { %v29_v10 = vpop.permute.xlu0 %28 }
  0xd8   :  { %v80_v7 = vpop.f32.mrb[0].mxu0 }
  0xd9   :  { %v81_v8 = vadd.f32 %v80_v7, %v24_v6  ;;  %v105_v9 = vpop.f32.mrb[1].mxu0 }
  0xda   :  { %v83_v11 = vpop.f32.mrb[2].mxu0 }
  0xdb   :  { %v87_v12 = vmax.f32 %v81_v8, 0.0  ;;  %v84_v13 = vadd.f32 %v83_v11, %v29_v10  ;;  %v106_v14 = vpop.f32.mrb[3].mxu0 }
  0xdd   :  { %90 = vst.msk [vmem:[%s157_s3] sm:$0xff] %vm89_vm2, %v87_v12  ;;  %v88_v15 = vmax.f32 %v84_v13, 0.0 }
  0xdf   :  { %91 = vst.msk [vmem:[%s157_s3 + $0x8] sm:$0xff] %vm89_vm2, %v88_v15 }

// kernel: reverse.6
= control target key start
LH: loop header
LB: loop body
LE: loop exit
PB: predicated region body
PF: predicated region fallthrough
CT: control target
= control target key end

     0   :  { %s80_s0 = inlined_call_operand.vmem [shape: f32[8,2,8,3], index: 0, kind: input, shape index: {}]   ;;  %s81_s1 = inlined_call_operand.vmem [shape: f32[8,2,8,3], index: 1, kind: output, shape index: {}]  }
   0x1   :  { %v24_v0 = vld [vmem:[%s80_s0 + $0x10] sm:$0xff]  ;;  %v25_v1 = vld [vmem:[%s80_s0 + $0x28] sm:$0xff]  ;;  %v29_v3 = vld [vmem:[%s80_s0 + $0x20] sm:$0xff] }
   0x2   :  { %v27_v2 = vld [vmem:[%s80_s0 + $0x8] sm:$0xff]  ;;  %4 = vst [vmem:[%s81_s1] sm:$0xff] %v24_v0  ;;  %26 = vst [vmem:[%s81_s1 + $0x18] sm:$0xff] %v25_v1  ;;  %v17_v4 = vld [vmem:[%s80_s0] sm:$0xff] }
   0x3   :  { %28 = vst [vmem:[%s81_s1 + $0x8] sm:$0xff] %v27_v2  ;;  %v32_v5 = vld [vmem:[%s80_s0 + $0x18] sm:$0xff]  ;;  %30 = vst [vmem:[%s81_s1 + $0x20] sm:$0xff] %v29_v3 }
   0x4   :  { %31 = vst [vmem:[%s81_s1 + $0x10] sm:$0xff] %v17_v4  ;;  %33 = vst [vmem:[%s81_s1 + $0x28] sm:$0xff] %v32_v5 }

// kernel: fwd.28
= control target key start
LH: loop header
LB: loop body
LE: loop exit
PB: predicated region body
PF: predicated region fallthrough
CT: control target
= control target key end

     0   :  { %v113_v0 = vmov 0.0   ;;  %vm114_vm0 = vmmov 0   ;;  %v115_v3 = vmov 0   ;;  %vm42_vm1 = vcmask 130048   ;;  %s154_s1 = inlined_call_operand.vmem [shape: bf16[16,80], index: 1, kind: input, shape index: {}]   ;;  %s155_s0 = inlined_call_operand.vmem [shape: bf16[16,16], index: 0, kind: input, shape index: {}]   ;;  %s156_s2 = inlined_call_operand.vmem [shape: f32[16,1], index: 2, kind: input, shape index: {}]   ;;  %s157_s3 = inlined_call_operand.vmem [shape: f32[16,80], index: 3, kind: output, shape index: {}]  }
   0x1   :  { %101 = vmatprep.subr.bf16.mxu0 %v113_v0  ;;  %v111_v1 = vld [vmem:[%s154_s1] sm:$0xff]   ;;  %103 = vmatprep.mubr.msk.bf16.mxu0 %vm114_vm0, %v113_v0  ;;  %v20_v5 = vld [vmem:[%s156_s2 + $0x8] sm:$0xff]  ;;  %vm89_vm2 = vcmask 654336  }
   0x2   :  { %v112_v2 = vld [vmem:[%s155_s0] sm:$0xff]   ;;  %110 = vset.pattern.permute.xlu0 %v115_v3  ;;  %102 = vmatpush3.bf16.msra.mxu0 %v111_v1 }
   0x3   :  { %v19_v4 = vld [vmem:[%s156_s2] sm:$0xff] }
   0x4   :  { %23 = vperm.xlu0 %110, %v19_v4  }
   0x5   :  { %104 = vmatmul.mubr.msk.bf16.vlgmr.msra.gmra.mrb[0].mxu0 %vm42_vm1, %v112_v2 }
   0x8   :  { %28 = vperm.xlu0 %110, %v20_v5  }
  0x83   :  { %v24_v6 = vpop.permute.xlu0 %23 }
  0x87   :  { %v29_v10 = vpop.permute.xlu0 %28 }
  0xd8   :  { %v80_v7 = vpop.f32.mrb[0].mxu0 }
  0xd9   :  { %v81_v8 = vadd.f32 %v80_v7, %v24_v6  ;;  %v105_v9 = vpop.f32.mrb[1].mxu0 }
  0xda   :  { %v83_v11 = vpop.f32.mrb[2].mxu0 }
  0xdb   :  { %v87_v12 = vmax.f32 %v81_v8, 0.0  ;;  %v84_v13 = vadd.f32 %v83_v11, %v29_v10  ;;  %v106_v14 = vpop.f32.mrb[3].mxu0 }
  0xdd   :  { %90 = vst.msk [vmem:[%s157_s3] sm:$0xff] %vm89_vm2, %v87_v12  ;;  %v88_v15 = vmax.f32 %v84_v13, 0.0 }
  0xdf   :  { %91 = vst.msk [vmem:[%s157_s3 + $0x8] sm:$0xff] %vm89_vm2, %v88_v15 }

// kernel: fwd.30
= control target key start
LH: loop header
LB: loop body
LE: loop exit
PB: predicated region body
PF: predicated region fallthrough
CT: control target
= control target key end

     0   :  { %v116_v0 = vmov 0.0   ;;  %vm117_vm0 = vmmov 0   ;;  %v118_v5 = vmov 0   ;;  %vm50_vm1 = vcmask 1043456   ;;  %s173_s1 = inlined_call_operand.vmem [shape: f32[8,128], index: 1, kind: input, shape index: {}]   ;;  %s174_s2 = inlined_call_operand.vmem [shape: f32[8,128], index: 2, kind: input, shape index: {}]   ;;  %s175_s3 = inlined_call_operand.vmem [shape: f32[8,128], index: 3, kind: input, shape index: {}]   ;;  %s176_s4 = inlined_call_operand.vmem [shape: f32[16,1], index: 4, kind: input, shape index: {}]   ;;  %s177_s0 = inlined_call_operand.vmem [shape: bf16[16,8], index: 0, kind: input, shape index: {}]   ;;  %s178_s5 = inlined_call_operand.vmem [shape: f32[16,128], index: 5, kind: output, shape index: {}]  }
   0x1   :  { %105 = vmatprep.subr.bf16.mxu0 %v116_v0  ;;  %v21_v1 = vld [vmem:[%s173_s1] sm:$0xff]  ;;  %107 = vmatprep.mubr.msk.bf16.mxu0 %vm117_vm0, %v116_v0  ;;  %v30_v8 = vld [vmem:[%s176_s4 + $0x8] sm:$0xff]  ;;  %vm46_vm2 = vcmask 64512  }
   0x2   :  { %v22_v2 = vld [vmem:[%s174_s2] sm:$0xff]  ;;  %114 = vset.pattern.permute.xlu0 %v118_v5 }
   0x3   :  { %v24_v3 = vld [vmem:[%s175_s3] sm:$0xff]  ;;  %v23_v4 = vadd.f32 %v22_v2, %v21_v1 }
   0x4   :  { %v29_v6 = vld [vmem:[%s176_s4] sm:$0xff] }
   0x5   :  { %v25_v7 = vadd.f32 %v24_v3, %v23_v4  ;;  %33 = vperm.xlu0 %114, %v29_v6   ;;  %v115_v11 = vld [vmem:[%s177_s0] sm:$0xff]  }
   0x7   :  { %v28_v9 = vpack.c.bf16 %v25_v7, %v25_v7 }
   0x9   :  { %v52_v10 = vsel %vm50_vm1, %v28_v9, 0  ;;  %38 = vperm.xlu0 %114, %v30_v8  }
   0xa   :  { %106 = vmatpush3.bf16.msra.mxu0 %v52_v10 }
   0xd   :  { %108 = vmatmul.mubr.msk.bf16.vlgmr.msra.gmra.mrb[0].mxu0 %vm46_vm2, %v115_v11 }
  0x84   :  { %v34_v12 = vpop.permute.xlu0 %33 }
  0x88   :  { %v39_v16 = vpop.permute.xlu0 %38 }
  0xe0   :  { %v88_v13 = vpop.f32.mrb[0].mxu0 }
  0xe1   :  { %v89_v14 = vadd.f32 %v88_v13, %v34_v12  ;;  %v109_v15 = vpop.f32.mrb[1].mxu0 }
  0xe2   :  { %v91_v17 = vpop.f32.mrb[2].mxu0 }
  0xe3   :  { %95 = vst [vmem:[%s178_s5] sm:$0xff] %v89_v14  ;;  %v92_v18 = vadd.f32 %v91_v17, %v39_v16  ;;  %v110_v19 = vpop.f32.mrb[3].mxu0 }
  0xe5   :  { %96 = vst [vmem:[%s178_s5 + $0x8] sm:$0xff] %v92_v18 }

</bundles_post_ra>
